<compile_context>
chip_gen: v6e
topology: v6e:2x2x1
jax: 0.10.0
libtpu: 0.0.40
codegen_flags: <defaults>
</compile_context>

<pallas_src>
import functools

import jax
import jax.numpy as jnp
from jax.experimental import pallas as pl
from jax.experimental.pallas import tpu as pltpu

EPS = 1e-5  # nn.LayerNorm default


def _layernorm(x, gamma, beta):
    # x: (S, E) f32; gamma/beta: (1, E) f32
    mu = jnp.mean(x, axis=-1, keepdims=True)
    xc = x - mu
    var = jnp.mean(xc * xc, axis=-1, keepdims=True)
    inv = jax.lax.rsqrt(var + EPS)
    return xc * inv * gamma + beta


def _mhsa_kernel(x_ref, wq_ref, wk_ref, wv_ref, g_ref, b_ref,
                 out_ref, k_ref, v_ref, o_ref, *,
                 num_heads, block_m, exp_dtype):
    """One (batch, m-tile) grid step.

    x_ref   : (N, E)     full sequence of this batch (K/V + query-tile source)
    wq_ref  : (H, E, D)  bf16, head-major, pre-transposed, scale folded in
    wk_ref  : (H, E, D)  bf16, head-major, pre-transposed
    wv_ref  : (H, E, D)  bf16, head-major, pre-transposed
    g_ref   : (1, E)     LayerNorm gamma (f32)
    b_ref   : (1, E)     LayerNorm beta  (f32)
    out_ref : (TM, E)
    k_ref   : (H, N, D)  bf16 VMEM scratch, resident across the m sweep
    v_ref   : (H, N, D)  bf16 VMEM scratch, resident across the m sweep
    o_ref   : (TM, E)    f32 VMEM scratch for the attention output of this tile
    """
    H = num_heads
    D = wq_ref.shape[2]

    # ---- once per batch (first m-tile): LN full sequence, project K and V ----
    @pl.when(pl.program_id(1) == 0)
    def _():
        xnf = _layernorm(x_ref[...].astype(jnp.float32), g_ref[...], b_ref[...])
        xnf = xnf.astype(jnp.bfloat16)                                 # (N, E)
        for h in range(H):
            k_ref[h] = jnp.dot(xnf, wk_ref[h],
                               preferred_element_type=jnp.float32
                               ).astype(jnp.bfloat16)                  # (N, D)
            v_ref[h] = jnp.dot(xnf, wv_ref[h],
                               preferred_element_type=jnp.float32
                               ).astype(jnp.bfloat16)                  # (N, D)

    # ---- per m-tile: LN the query tile sliced from the resident x block ------
    start = pl.multiple_of(pl.program_id(1) * block_m, block_m)
    xt = x_ref[pl.ds(start, block_m), :].astype(jnp.float32)
    xnt = _layernorm(xt, g_ref[...], b_ref[...])                       # (TM, E) f32
    xnt_bf = xnt.astype(jnp.bfloat16)

    # ---- attention per head; one head's intermediates live at a time ---------
    dn_qk = (((1,), (1,)), ((), ()))       # contract last axes -> (TM, N)
    for h in range(H):
        qh = jnp.dot(xnt_bf, wq_ref[h],
                     preferred_element_type=jnp.float32).astype(jnp.bfloat16)
        s = jax.lax.dot_general(qh, k_ref[h], dn_qk,
                                preferred_element_type=jnp.float32)    # (TM, N)
        s_max = jnp.max(s, axis=-1, keepdims=True)
        p = jnp.exp((s - s_max).astype(exp_dtype))
        l = jnp.sum(p, axis=-1, keepdims=True, dtype=jnp.float32)      # (TM, 1)
        oh = jnp.dot(p.astype(jnp.bfloat16), v_ref[h],
                     preferred_element_type=jnp.float32)               # (TM, D)
        o_ref[:, h * D:(h + 1) * D] = oh * pl.reciprocal(l, approx=False)

    # out = attn_out + norm(x)   (module adds the residual AFTER the norm)
    out_ref[...] = (o_ref[...] + xnt).astype(out_ref.dtype)


def multi_head_self_attention(x, wq, wk, wv, gamma, beta, num_heads=8,
                              qk_scale=None, block_m=None,
                              vmem_limit_bytes=None, exp_dtype=None):
    """x: (B, N, E); weights in PyTorch nn.Linear layout (out, in). Returns (B, N, E)."""
    B, N, E = x.shape
    assert E % num_heads == 0, "dim must be divisible by num_heads"
    H = num_heads
    D = E // H
    scale = qk_scale if qk_scale is not None else D ** (-0.5)

    # ---- query-tile size: bound the (TM, N) f32 score working set ------------
    if block_m is None:
        cap = 256 if N >= 2048 else 512
        if N <= cap:
            block_m = N
        else:
            block_m = next((t for t in (512, 256, 128, 64, 32, 16, 8)
                            if t <= cap and N % t == 0), N)
    assert N % block_m == 0
    m_tiles = N // block_m

    # ---- wrapper-side layout plumbing (free) ----------------------------------
    # nn.Linear weight is (out, in); pack head-major (H, E_in, D) bf16 operands
    # so per-head selection in the kernel is a free major-axis index.
    def head_major(w, s=1.0):
        wt = (w.T * s).astype(jnp.bfloat16)            # (E_in, E_out)
        return wt.reshape(E, H, D).transpose(1, 0, 2)  # (H, E_in, D)

    w_q = head_major(wq, scale)        # attention scale folded into Wq
    w_k = head_major(wk)
    w_v = head_major(wv)
    gamma = gamma.reshape(1, E).astype(jnp.float32)
    beta = beta.reshape(1, E).astype(jnp.float32)

    # ---- generation-aware exp dtype / VMEM budgeting --------------------------
    try:
        kind = jax.devices()[0].device_kind.lower()
    except Exception:
        kind = ""
    if exp_dtype is None:
        # bf16 exp relieves the single EUP slot on v6e/v7x; v5e EUP has no bf16.
        exp_dtype = jnp.bfloat16 if ("v6" in kind or "v7" in kind) else jnp.float32

    try:
        vmem_cap = int(pltpu.get_tpu_info().vmem_capacity_bytes)
    except Exception:
        vmem_cap = 64 * 1024 * 1024    # conservative (v7x physical size)

    itemsize = jnp.dtype(x.dtype).itemsize
    d_pad = -(-D // 128) * 128         # lane padding of the head dim
    ws = (N * E * itemsize             # resident x block
          + 2 * block_m * E * itemsize # double-buffered output tile
          + 3 * H * E * d_pad * 2      # bf16 head-major weights
          + 2 * H * N * d_pad * 2      # bf16 K / V scratch
          + block_m * E * 4            # f32 per-tile output scratch
          + 2 * block_m * N * 4)       # f32 score / prob intermediates
    if vmem_limit_bytes is None and ws > 8 * 1024 * 1024:
        vmem_limit_bytes = int(min(max(1.5 * ws, 32 * 1024 * 1024),
                                   0.78 * vmem_cap))
    # Single-buffer constant-index operands only when VMEM is tight: their
    # block index never changes within a batch, so double-buffering only buys
    # prefetch across the per-batch boundary.
    single_buffer = ws > 0.45 * vmem_cap

    def const_spec(shape, index_map):
        if single_buffer:
            return pl.BlockSpec(shape, index_map, pipeline_mode=pl.Buffered(1))
        return pl.BlockSpec(shape, index_map)

    kernel = functools.partial(_mhsa_kernel, num_heads=H, block_m=block_m,
                               exp_dtype=exp_dtype)

    cost = pl.CostEstimate(
        flops=int(6 * B * N * E * E + 4 * B * N * N * E),
        transcendentals=int(B * H * N * N),
        bytes_accessed=int(2 * B * N * E * itemsize + 3 * H * E * D * 2 + 2 * E * 4),
    )

    grid_spec = pltpu.PrefetchScalarGridSpec(
        num_scalar_prefetch=0,
        grid=(B, m_tiles),
        in_specs=[
            const_spec((None, N, E), lambda b, m: (b, 0, 0)),   # x (full sequence)
            const_spec((H, E, D), lambda b, m: (0, 0, 0)),      # Wq.T * scale
            const_spec((H, E, D), lambda b, m: (0, 0, 0)),      # Wk.T
            const_spec((H, E, D), lambda b, m: (0, 0, 0)),      # Wv.T
            pl.BlockSpec((1, E), lambda b, m: (0, 0)),          # gamma
            pl.BlockSpec((1, E), lambda b, m: (0, 0)),          # beta
        ],
        out_specs=pl.BlockSpec((None, block_m, E), lambda b, m: (b, m, 0)),
        scratch_shapes=[
            pltpu.VMEM((H, N, D), jnp.bfloat16),     # K, head-major
            pltpu.VMEM((H, N, D), jnp.bfloat16),     # V, head-major
            pltpu.VMEM((block_m, E), jnp.float32),   # per-tile attention output
        ],
    )

    return pl.pallas_call(
        kernel,
        out_shape=jax.ShapeDtypeStruct((B, N, E), x.dtype),
        grid_spec=grid_spec,
        compiler_params=pltpu.CompilerParams(
            dimension_semantics=("parallel", "arbitrary"),
            vmem_limit_bytes=vmem_limit_bytes,
        ),
        cost_estimate=cost,
    )(x, w_q, w_k, w_v, gamma, beta)


def _reference(x, wq, wk, wv, gamma, beta, num_heads, scale):
    """Pure-JAX f32 reference matching the PyTorch forward."""
    B, N, E = x.shape
    D = E // num_heads
    mu = jnp.mean(x, axis=-1, keepdims=True)
    var = jnp.mean((x - mu) ** 2, axis=-1, keepdims=True)
    xn = (x - mu) / jnp.sqrt(var + EPS) * gamma + beta
    q = jnp.einsum('bne,oe->bno', xn, wq).reshape(B, N, num_heads, D).transpose(0, 2, 1, 3)
    k = jnp.einsum('bne,oe->bno', xn, wk).reshape(B, N, num_heads, D).transpose(0, 2, 1, 3)
    v = jnp.einsum('bne,oe->bno', xn, wv).reshape(B, N, num_heads, D).transpose(0, 2, 1, 3)
    s = jnp.einsum('bhmd,bhnd->bhmn', q, k) * scale
    p = jax.nn.softmax(s, axis=-1)
    o = jnp.einsum('bhmn,bhnd->bhmd', p, v)
    o = o.transpose(0, 2, 1, 3).reshape(B, N, E)
    return o + xn


if __name__ == "__main__":
    B, N, E, H = 2, 8, 32, 8          # batch, seq, dim, heads  (head_dim = 4)
    key = jax.random.PRNGKey(0)
    kx, kq, kk, kv = jax.random.split(key, 4)

    x = jax.random.normal(kx, (B, N, E), dtype=jnp.float32)

    # nn.Linear(dim, dim, bias=False): weight (out, in), uniform(-1/sqrt(in), +).
    bound = 1.0 / (E ** 0.5)
    wq = jax.random.uniform(kq, (E, E), jnp.float32, -bound, bound)
    wk = jax.random.uniform(kk, (E, E), jnp.float32, -bound, bound)
    wv = jax.random.uniform(kv, (E, E), jnp.float32, -bound, bound)

    # nn.LayerNorm default init: weight=1, bias=0.
    gamma = jnp.ones((E,), jnp.float32)
    beta = jnp.zeros((E,), jnp.float32)

    out = multi_head_self_attention(x, wq, wk, wv, gamma, beta, num_heads=H)
    out = jax.block_until_ready(out)

    ref = _reference(x, wq, wk, wv, gamma, beta, H, (E // H) ** (-0.5))
    assert out.shape == (B, N, E)
    # bf16 MXU operands (and bf16 exp on v6e/v7x) -> compare to the f32
    # reference with a loose-but-bug-catching tolerance.
    err = jnp.max(jnp.abs(out - ref))
    assert jnp.allclose(out, ref, atol=3e-2, rtol=3e-2), f"mismatch vs reference: {err}"

    print("KERNEL_OK")
</pallas_src>

<mosaic_0001>
module attributes {stable_mosaic.version = 11 : i64} {
  func.func @_mhsa_kernel(%arg0: i32, %arg1: i32, %arg2: memref<1x8x32xf32, #tpu.memory_space<vmem>>, %arg3: memref<8x32x4xbf16, #tpu.memory_space<vmem>>, %arg4: memref<8x32x4xbf16, #tpu.memory_space<vmem>>, %arg5: memref<8x32x4xbf16, #tpu.memory_space<vmem>>, %arg6: memref<1x32xf32, #tpu.memory_space<vmem>>, %arg7: memref<1x32xf32, #tpu.memory_space<vmem>>, %arg8: memref<1x8x32xf32, #tpu.memory_space<vmem>>, %arg9: memref<8x8x4xbf16, #tpu.memory_space<vmem>>, %arg10: memref<8x8x4xbf16, #tpu.memory_space<vmem>>, %arg11: memref<8x32xf32, #tpu.memory_space<vmem>>) attributes {dimension_semantics = [#tpu.dimension_semantics<parallel>, #tpu.dimension_semantics<arbitrary>], iteration_bounds = array<i64: 2, 1>, scalar_prefetch = 0 : i64, scratch_operands = 3 : i64, tpu.core_type = #tpu.core_type<tc>, window_params = [{transform_indices = @transform_0, window_bounds = array<i64: 1, 8, 32>}, {pipeline_mode = #tpu.pipeline_mode<synchronous>, transform_indices = @transform_1, window_bounds = array<i64: 8, 32, 4>}, {pipeline_mode = #tpu.pipeline_mode<synchronous>, transform_indices = @transform_2, window_bounds = array<i64: 8, 32, 4>}, {pipeline_mode = #tpu.pipeline_mode<synchronous>, transform_indices = @transform_3, window_bounds = array<i64: 8, 32, 4>}, {pipeline_mode = #tpu.pipeline_mode<synchronous>, transform_indices = @transform_4, window_bounds = array<i64: 1, 32>}, {pipeline_mode = #tpu.pipeline_mode<synchronous>, transform_indices = @transform_5, window_bounds = array<i64: 1, 32>}, {transform_indices = @transform_6, window_bounds = array<i64: 1, 8, 32>}]} {
    %c0_i32 = arith.constant 0 : i32
    %0 = arith.cmpi eq, %arg1, %c0_i32 : i32
    %1 = arith.extui %0 : i1 to i32
    %c0_i32_0 = arith.constant 0 : i32
    %2 = arith.cmpi ne, %1, %c0_i32_0 : i32
    scf.if %2 {
      %c0_130 = arith.constant 0 : index
      %c0_131 = arith.constant 0 : index
      %c0_132 = arith.constant 0 : index
      %212 = vector.load %arg2[%c0_130, %c0_131, %c0_132] : memref<1x8x32xf32, #tpu.memory_space<vmem>>, vector<1x8x32xf32>
      %213 = vector.shape_cast %212 : vector<1x8x32xf32> to vector<8x32xf32>
      %c0_133 = arith.constant 0 : index
      %c0_134 = arith.constant 0 : index
      %214 = vector.load %arg6[%c0_133, %c0_134] : memref<1x32xf32, #tpu.memory_space<vmem>>, vector<1x32xf32>
      %c0_135 = arith.constant 0 : index
      %c0_136 = arith.constant 0 : index
      %215 = vector.load %arg7[%c0_135, %c0_136] : memref<1x32xf32, #tpu.memory_space<vmem>>, vector<1x32xf32>
      %cst_137 = arith.constant dense<0.000000e+00> : vector<8xf32>
      %216 = vector.multi_reduction <add>, %213, %cst_137 [1] : vector<8x32xf32> to vector<8xf32>
      %217 = vector.shape_cast %216 : vector<8xf32> to vector<8x1xf32>
      %cst_138 = arith.constant 3.200000e+01 : f32
      %218 = vector.broadcast %cst_138 : f32 to vector<8x1xf32>
      %219 = arith.divf %217, %218 : vector<8x1xf32>
      %220 = vector.broadcast %219 : vector<8x1xf32> to vector<8x32xf32>
      %221 = arith.subf %213, %220 : vector<8x32xf32>
      %222 = arith.mulf %221, %221 : vector<8x32xf32>
      %cst_139 = arith.constant dense<0.000000e+00> : vector<8xf32>
      %223 = vector.multi_reduction <add>, %222, %cst_139 [1] : vector<8x32xf32> to vector<8xf32>
      %224 = vector.shape_cast %223 : vector<8xf32> to vector<8x1xf32>
      %cst_140 = arith.constant 3.200000e+01 : f32
      %225 = vector.broadcast %cst_140 : f32 to vector<8x1xf32>
      %226 = arith.divf %224, %225 : vector<8x1xf32>
      %cst_141 = arith.constant 9.99999974E-6 : f32
      %227 = vector.broadcast %cst_141 : f32 to vector<8x1xf32>
      %228 = arith.addf %226, %227 : vector<8x1xf32>
      %229 = math.rsqrt %228 : vector<8x1xf32>
      %230 = vector.broadcast %229 : vector<8x1xf32> to vector<8x32xf32>
      %231 = arith.mulf %221, %230 : vector<8x32xf32>
      %232 = vector.broadcast %214 : vector<1x32xf32> to vector<8x32xf32>
      %233 = arith.mulf %231, %232 : vector<8x32xf32>
      %234 = vector.broadcast %215 : vector<1x32xf32> to vector<8x32xf32>
      %235 = arith.addf %233, %234 : vector<8x32xf32>
      %236 = arith.truncf %235 : vector<8x32xf32> to vector<8x32xbf16>
      %c0_142 = arith.constant 0 : index
      %c0_143 = arith.constant 0 : index
      %c0_144 = arith.constant 0 : index
      %237 = vector.load %arg4[%c0_142, %c0_143, %c0_144] : memref<8x32x4xbf16, #tpu.memory_space<vmem>>, vector<1x32x4xbf16>
      %238 = vector.shape_cast %237 : vector<1x32x4xbf16> to vector<32x4xbf16>
      %cst_145 = arith.constant dense<0.000000e+00> : vector<8x4xf32>
      %239 = tpu.matmul %236, %238, %cst_145 {dimension_numbers = #tpu.dot_dimension_numbers<[1], [0], [0], [1], [0, 0, 1, 1], [], []>} : vector<8x32xbf16>, vector<32x4xbf16>, vector<8x4xf32> -> vector<8x4xf32>
      %240 = arith.truncf %239 : vector<8x4xf32> to vector<8x4xbf16>
      %c0_146 = arith.constant 0 : index
      %c0_147 = arith.constant 0 : index
      %c0_148 = arith.constant 0 : index
      %241 = vector.load %arg9[%c0_146, %c0_147, %c0_148] : memref<8x8x4xbf16, #tpu.memory_space<vmem>>, vector<1x8x4xbf16>
      %242 = vector.shape_cast %241 : vector<1x8x4xbf16> to vector<8x4xbf16>
      %243 = vector.shape_cast %240 : vector<8x4xbf16> to vector<1x8x4xbf16>
      tpu.vector_store %arg9[%c0_146, %c0_147, %c0_148], %243 {strides = array<i32>} : memref<8x8x4xbf16, #tpu.memory_space<vmem>>, vector<1x8x4xbf16>,
      %c0_149 = arith.constant 0 : index
      %c0_150 = arith.constant 0 : index
      %c0_151 = arith.constant 0 : index
      %244 = vector.load %arg5[%c0_149, %c0_150, %c0_151] : memref<8x32x4xbf16, #tpu.memory_space<vmem>>, vector<1x32x4xbf16>
      %245 = vector.shape_cast %244 : vector<1x32x4xbf16> to vector<32x4xbf16>
      %cst_152 = arith.constant dense<0.000000e+00> : vector<8x4xf32>
      %246 = tpu.matmul %236, %245, %cst_152 {dimension_numbers = #tpu.dot_dimension_numbers<[1], [0], [0], [1], [0, 0, 1, 1], [], []>} : vector<8x32xbf16>, vector<32x4xbf16>, vector<8x4xf32> -> vector<8x4xf32>
      %247 = arith.truncf %246 : vector<8x4xf32> to vector<8x4xbf16>
      %c0_153 = arith.constant 0 : index
      %c0_154 = arith.constant 0 : index
      %c0_155 = arith.constant 0 : index
      %248 = vector.load %arg10[%c0_153, %c0_154, %c0_155] : memref<8x8x4xbf16, #tpu.memory_space<vmem>>, vector<1x8x4xbf16>
      %249 = vector.shape_cast %248 : vector<1x8x4xbf16> to vector<8x4xbf16>
      %250 = vector.shape_cast %247 : vector<8x4xbf16> to vector<1x8x4xbf16>
      tpu.vector_store %arg10[%c0_153, %c0_154, %c0_155], %250 {strides = array<i32>} : memref<8x8x4xbf16, #tpu.memory_space<vmem>>, vector<1x8x4xbf16>,
      %c1_156 = arith.constant 1 : index
      %c0_157 = arith.constant 0 : index
      %c0_158 = arith.constant 0 : index
      %251 = vector.load %arg4[%c1_156, %c0_157, %c0_158] : memref<8x32x4xbf16, #tpu.memory_space<vmem>>, vector<1x32x4xbf16>
      %252 = vector.shape_cast %251 : vector<1x32x4xbf16> to vector<32x4xbf16>
      %cst_159 = arith.constant dense<0.000000e+00> : vector<8x4xf32>
      %253 = tpu.matmul %236, %252, %cst_159 {dimension_numbers = #tpu.dot_dimension_numbers<[1], [0], [0], [1], [0, 0, 1, 1], [], []>} : vector<8x32xbf16>, vector<32x4xbf16>, vector<8x4xf32> -> vector<8x4xf32>
      %254 = arith.truncf %253 : vector<8x4xf32> to vector<8x4xbf16>
      %c1_160 = arith.constant 1 : index
      %c0_161 = arith.constant 0 : index
      %c0_162 = arith.constant 0 : index
      %255 = vector.load %arg9[%c1_160, %c0_161, %c0_162] : memref<8x8x4xbf16, #tpu.memory_space<vmem>>, vector<1x8x4xbf16>
      %256 = vector.shape_cast %255 : vector<1x8x4xbf16> to vector<8x4xbf16>
      %257 = vector.shape_cast %254 : vector<8x4xbf16> to vector<1x8x4xbf16>
      tpu.vector_store %arg9[%c1_160, %c0_161, %c0_162], %257 {strides = array<i32>} : memref<8x8x4xbf16, #tpu.memory_space<vmem>>, vector<1x8x4xbf16>,
      %c1_163 = arith.constant 1 : index
      %c0_164 = arith.constant 0 : index
      %c0_165 = arith.constant 0 : index
      %258 = vector.load %arg5[%c1_163, %c0_164, %c0_165] : memref<8x32x4xbf16, #tpu.memory_space<vmem>>, vector<1x32x4xbf16>
      %259 = vector.shape_cast %258 : vector<1x32x4xbf16> to vector<32x4xbf16>
      %cst_166 = arith.constant dense<0.000000e+00> : vector<8x4xf32>
      %260 = tpu.matmul %236, %259, %cst_166 {dimension_numbers = #tpu.dot_dimension_numbers<[1], [0], [0], [1], [0, 0, 1, 1], [], []>} : vector<8x32xbf16>, vector<32x4xbf16>, vector<8x4xf32> -> vector<8x4xf32>
      %261 = arith.truncf %260 : vector<8x4xf32> to vector<8x4xbf16>
      %c1_167 = arith.constant 1 : index
      %c0_168 = arith.constant 0 : index
      %c0_169 = arith.constant 0 : index
      %262 = vector.load %arg10[%c1_167, %c0_168, %c0_169] : memref<8x8x4xbf16, #tpu.memory_space<vmem>>, vector<1x8x4xbf16>
      %263 = vector.shape_cast %262 : vector<1x8x4xbf16> to vector<8x4xbf16>
      %264 = vector.shape_cast %261 : vector<8x4xbf16> to vector<1x8x4xbf16>
      tpu.vector_store %arg10[%c1_167, %c0_168, %c0_169], %264 {strides = array<i32>} : memref<8x8x4xbf16, #tpu.memory_space<vmem>>, vector<1x8x4xbf16>,
      %c2_170 = arith.constant 2 : index
      %c0_171 = arith.constant 0 : index
      %c0_172 = arith.constant 0 : index
      %265 = vector.load %arg4[%c2_170, %c0_171, %c0_172] : memref<8x32x4xbf16, #tpu.memory_space<vmem>>, vector<1x32x4xbf16>
      %266 = vector.shape_cast %265 : vector<1x32x4xbf16> to vector<32x4xbf16>
      %cst_173 = arith.constant dense<0.000000e+00> : vector<8x4xf32>
      %267 = tpu.matmul %236, %266, %cst_173 {dimension_numbers = #tpu.dot_dimension_numbers<[1], [0], [0], [1], [0, 0, 1, 1], [], []>} : vector<8x32xbf16>, vector<32x4xbf16>, vector<8x4xf32> -> vector<8x4xf32>
      %268 = arith.truncf %267 : vector<8x4xf32> to vector<8x4xbf16>
      %c2_174 = arith.constant 2 : index
      %c0_175 = arith.constant 0 : index
      %c0_176 = arith.constant 0 : index
      %269 = vector.load %arg9[%c2_174, %c0_175, %c0_176] : memref<8x8x4xbf16, #tpu.memory_space<vmem>>, vector<1x8x4xbf16>
      %270 = vector.shape_cast %269 : vector<1x8x4xbf16> to vector<8x4xbf16>
      %271 = vector.shape_cast %268 : vector<8x4xbf16> to vector<1x8x4xbf16>
      tpu.vector_store %arg9[%c2_174, %c0_175, %c0_176], %271 {strides = array<i32>} : memref<8x8x4xbf16, #tpu.memory_space<vmem>>, vector<1x8x4xbf16>,
      %c2_177 = arith.constant 2 : index
      %c0_178 = arith.constant 0 : index
      %c0_179 = arith.constant 0 : index
      %272 = vector.load %arg5[%c2_177, %c0_178, %c0_179] : memref<8x32x4xbf16, #tpu.memory_space<vmem>>, vector<1x32x4xbf16>
      %273 = vector.shape_cast %272 : vector<1x32x4xbf16> to vector<32x4xbf16>
      %cst_180 = arith.constant dense<0.000000e+00> : vector<8x4xf32>
      %274 = tpu.matmul %236, %273, %cst_180 {dimension_numbers = #tpu.dot_dimension_numbers<[1], [0], [0], [1], [0, 0, 1, 1], [], []>} : vector<8x32xbf16>, vector<32x4xbf16>, vector<8x4xf32> -> vector<8x4xf32>
      %275 = arith.truncf %274 : vector<8x4xf32> to vector<8x4xbf16>
      %c2_181 = arith.constant 2 : index
      %c0_182 = arith.constant 0 : index
      %c0_183 = arith.constant 0 : index
      %276 = vector.load %arg10[%c2_181, %c0_182, %c0_183] : memref<8x8x4xbf16, #tpu.memory_space<vmem>>, vector<1x8x4xbf16>
      %277 = vector.shape_cast %276 : vector<1x8x4xbf16> to vector<8x4xbf16>
      %278 = vector.shape_cast %275 : vector<8x4xbf16> to vector<1x8x4xbf16>
      tpu.vector_store %arg10[%c2_181, %c0_182, %c0_183], %278 {strides = array<i32>} : memref<8x8x4xbf16, #tpu.memory_space<vmem>>, vector<1x8x4xbf16>,
      %c3_184 = arith.constant 3 : index
      %c0_185 = arith.constant 0 : index
      %c0_186 = arith.constant 0 : index
      %279 = vector.load %arg4[%c3_184, %c0_185, %c0_186] : memref<8x32x4xbf16, #tpu.memory_space<vmem>>, vector<1x32x4xbf16>
      %280 = vector.shape_cast %279 : vector<1x32x4xbf16> to vector<32x4xbf16>
      %cst_187 = arith.constant dense<0.000000e+00> : vector<8x4xf32>
      %281 = tpu.matmul %236, %280, %cst_187 {dimension_numbers = #tpu.dot_dimension_numbers<[1], [0], [0], [1], [0, 0, 1, 1], [], []>} : vector<8x32xbf16>, vector<32x4xbf16>, vector<8x4xf32> -> vector<8x4xf32>
      %282 = arith.truncf %281 : vector<8x4xf32> to vector<8x4xbf16>
      %c3_188 = arith.constant 3 : index
      %c0_189 = arith.constant 0 : index
      %c0_190 = arith.constant 0 : index
      %283 = vector.load %arg9[%c3_188, %c0_189, %c0_190] : memref<8x8x4xbf16, #tpu.memory_space<vmem>>, vector<1x8x4xbf16>
      %284 = vector.shape_cast %283 : vector<1x8x4xbf16> to vector<8x4xbf16>
      %285 = vector.shape_cast %282 : vector<8x4xbf16> to vector<1x8x4xbf16>
      tpu.vector_store %arg9[%c3_188, %c0_189, %c0_190], %285 {strides = array<i32>} : memref<8x8x4xbf16, #tpu.memory_space<vmem>>, vector<1x8x4xbf16>,
      %c3_191 = arith.constant 3 : index
      %c0_192 = arith.constant 0 : index
      %c0_193 = arith.constant 0 : index
      %286 = vector.load %arg5[%c3_191, %c0_192, %c0_193] : memref<8x32x4xbf16, #tpu.memory_space<vmem>>, vector<1x32x4xbf16>
      %287 = vector.shape_cast %286 : vector<1x32x4xbf16> to vector<32x4xbf16>
      %cst_194 = arith.constant dense<0.000000e+00> : vector<8x4xf32>
      %288 = tpu.matmul %236, %287, %cst_194 {dimension_numbers = #tpu.dot_dimension_numbers<[1], [0], [0], [1], [0, 0, 1, 1], [], []>} : vector<8x32xbf16>, vector<32x4xbf16>, vector<8x4xf32> -> vector<8x4xf32>
      %289 = arith.truncf %288 : vector<8x4xf32> to vector<8x4xbf16>
      %c3_195 = arith.constant 3 : index
      %c0_196 = arith.constant 0 : index
      %c0_197 = arith.constant 0 : index
      %290 = vector.load %arg10[%c3_195, %c0_196, %c0_197] : memref<8x8x4xbf16, #tpu.memory_space<vmem>>, vector<1x8x4xbf16>
      %291 = vector.shape_cast %290 : vector<1x8x4xbf16> to vector<8x4xbf16>
      %292 = vector.shape_cast %289 : vector<8x4xbf16> to vector<1x8x4xbf16>
      tpu.vector_store %arg10[%c3_195, %c0_196, %c0_197], %292 {strides = array<i32>} : memref<8x8x4xbf16, #tpu.memory_space<vmem>>, vector<1x8x4xbf16>,
      %c4_198 = arith.constant 4 : index
      %c0_199 = arith.constant 0 : index
      %c0_200 = arith.constant 0 : index
      %293 = vector.load %arg4[%c4_198, %c0_199, %c0_200] : memref<8x32x4xbf16, #tpu.memory_space<vmem>>, vector<1x32x4xbf16>
      %294 = vector.shape_cast %293 : vector<1x32x4xbf16> to vector<32x4xbf16>
      %cst_201 = arith.constant dense<0.000000e+00> : vector<8x4xf32>
      %295 = tpu.matmul %236, %294, %cst_201 {dimension_numbers = #tpu.dot_dimension_numbers<[1], [0], [0], [1], [0, 0, 1, 1], [], []>} : vector<8x32xbf16>, vector<32x4xbf16>, vector<8x4xf32> -> vector<8x4xf32>
      %296 = arith.truncf %295 : vector<8x4xf32> to vector<8x4xbf16>
      %c4_202 = arith.constant 4 : index
      %c0_203 = arith.constant 0 : index
      %c0_204 = arith.constant 0 : index
      %297 = vector.load %arg9[%c4_202, %c0_203, %c0_204] : memref<8x8x4xbf16, #tpu.memory_space<vmem>>, vector<1x8x4xbf16>
      %298 = vector.shape_cast %297 : vector<1x8x4xbf16> to vector<8x4xbf16>
      %299 = vector.shape_cast %296 : vector<8x4xbf16> to vector<1x8x4xbf16>
      tpu.vector_store %arg9[%c4_202, %c0_203, %c0_204], %299 {strides = array<i32>} : memref<8x8x4xbf16, #tpu.memory_space<vmem>>, vector<1x8x4xbf16>,
      %c4_205 = arith.constant 4 : index
      %c0_206 = arith.constant 0 : index
      %c0_207 = arith.constant 0 : index
      %300 = vector.load %arg5[%c4_205, %c0_206, %c0_207] : memref<8x32x4xbf16, #tpu.memory_space<vmem>>, vector<1x32x4xbf16>
      %301 = vector.shape_cast %300 : vector<1x32x4xbf16> to vector<32x4xbf16>
      %cst_208 = arith.constant dense<0.000000e+00> : vector<8x4xf32>
      %302 = tpu.matmul %236, %301, %cst_208 {dimension_numbers = #tpu.dot_dimension_numbers<[1], [0], [0], [1], [0, 0, 1, 1], [], []>} : vector<8x32xbf16>, vector<32x4xbf16>, vector<8x4xf32> -> vector<8x4xf32>
      %303 = arith.truncf %302 : vector<8x4xf32> to vector<8x4xbf16>
      %c4_209 = arith.constant 4 : index
      %c0_210 = arith.constant 0 : index
      %c0_211 = arith.constant 0 : index
      %304 = vector.load %arg10[%c4_209, %c0_210, %c0_211] : memref<8x8x4xbf16, #tpu.memory_space<vmem>>, vector<1x8x4xbf16>
      %305 = vector.shape_cast %304 : vector<1x8x4xbf16> to vector<8x4xbf16>
      %306 = vector.shape_cast %303 : vector<8x4xbf16> to vector<1x8x4xbf16>
      tpu.vector_store %arg10[%c4_209, %c0_210, %c0_211], %306 {strides = array<i32>} : memref<8x8x4xbf16, #tpu.memory_space<vmem>>, vector<1x8x4xbf16>,
      %c5_212 = arith.constant 5 : index
      %c0_213 = arith.constant 0 : index
      %c0_214 = arith.constant 0 : index
      %307 = vector.load %arg4[%c5_212, %c0_213, %c0_214] : memref<8x32x4xbf16, #tpu.memory_space<vmem>>, vector<1x32x4xbf16>
      %308 = vector.shape_cast %307 : vector<1x32x4xbf16> to vector<32x4xbf16>
      %cst_215 = arith.constant dense<0.000000e+00> : vector<8x4xf32>
      %309 = tpu.matmul %236, %308, %cst_215 {dimension_numbers = #tpu.dot_dimension_numbers<[1], [0], [0], [1], [0, 0, 1, 1], [], []>} : vector<8x32xbf16>, vector<32x4xbf16>, vector<8x4xf32> -> vector<8x4xf32>
      %310 = arith.truncf %309 : vector<8x4xf32> to vector<8x4xbf16>
      %c5_216 = arith.constant 5 : index
      %c0_217 = arith.constant 0 : index
      %c0_218 = arith.constant 0 : index
      %311 = vector.load %arg9[%c5_216, %c0_217, %c0_218] : memref<8x8x4xbf16, #tpu.memory_space<vmem>>, vector<1x8x4xbf16>
      %312 = vector.shape_cast %311 : vector<1x8x4xbf16> to vector<8x4xbf16>
      %313 = vector.shape_cast %310 : vector<8x4xbf16> to vector<1x8x4xbf16>
      tpu.vector_store %arg9[%c5_216, %c0_217, %c0_218], %313 {strides = array<i32>} : memref<8x8x4xbf16, #tpu.memory_space<vmem>>, vector<1x8x4xbf16>,
      %c5_219 = arith.constant 5 : index
      %c0_220 = arith.constant 0 : index
      %c0_221 = arith.constant 0 : index
      %314 = vector.load %arg5[%c5_219, %c0_220, %c0_221] : memref<8x32x4xbf16, #tpu.memory_space<vmem>>, vector<1x32x4xbf16>
      %315 = vector.shape_cast %314 : vector<1x32x4xbf16> to vector<32x4xbf16>
      %cst_222 = arith.constant dense<0.000000e+00> : vector<8x4xf32>
      %316 = tpu.matmul %236, %315, %cst_222 {dimension_numbers = #tpu.dot_dimension_numbers<[1], [0], [0], [1], [0, 0, 1, 1], [], []>} : vector<8x32xbf16>, vector<32x4xbf16>, vector<8x4xf32> -> vector<8x4xf32>
      %317 = arith.truncf %316 : vector<8x4xf32> to vector<8x4xbf16>
      %c5_223 = arith.constant 5 : index
      %c0_224 = arith.constant 0 : index
      %c0_225 = arith.constant 0 : index
      %318 = vector.load %arg10[%c5_223, %c0_224, %c0_225] : memref<8x8x4xbf16, #tpu.memory_space<vmem>>, vector<1x8x4xbf16>
      %319 = vector.shape_cast %318 : vector<1x8x4xbf16> to vector<8x4xbf16>
      %320 = vector.shape_cast %317 : vector<8x4xbf16> to vector<1x8x4xbf16>
      tpu.vector_store %arg10[%c5_223, %c0_224, %c0_225], %320 {strides = array<i32>} : memref<8x8x4xbf16, #tpu.memory_space<vmem>>, vector<1x8x4xbf16>,
      %c6_226 = arith.constant 6 : index
      %c0_227 = arith.constant 0 : index
      %c0_228 = arith.constant 0 : index
      %321 = vector.load %arg4[%c6_226, %c0_227, %c0_228] : memref<8x32x4xbf16, #tpu.memory_space<vmem>>, vector<1x32x4xbf16>
      %322 = vector.shape_cast %321 : vector<1x32x4xbf16> to vector<32x4xbf16>
      %cst_229 = arith.constant dense<0.000000e+00> : vector<8x4xf32>
      %323 = tpu.matmul %236, %322, %cst_229 {dimension_numbers = #tpu.dot_dimension_numbers<[1], [0], [0], [1], [0, 0, 1, 1], [], []>} : vector<8x32xbf16>, vector<32x4xbf16>, vector<8x4xf32> -> vector<8x4xf32>
      %324 = arith.truncf %323 : vector<8x4xf32> to vector<8x4xbf16>
      %c6_230 = arith.constant 6 : index
      %c0_231 = arith.constant 0 : index
      %c0_232 = arith.constant 0 : index
      %325 = vector.load %arg9[%c6_230, %c0_231, %c0_232] : memref<8x8x4xbf16, #tpu.memory_space<vmem>>, vector<1x8x4xbf16>
      %326 = vector.shape_cast %325 : vector<1x8x4xbf16> to vector<8x4xbf16>
      %327 = vector.shape_cast %324 : vector<8x4xbf16> to vector<1x8x4xbf16>
      tpu.vector_store %arg9[%c6_230, %c0_231, %c0_232], %327 {strides = array<i32>} : memref<8x8x4xbf16, #tpu.memory_space<vmem>>, vector<1x8x4xbf16>,
      %c6_233 = arith.constant 6 : index
      %c0_234 = arith.constant 0 : index
      %c0_235 = arith.constant 0 : index
      %328 = vector.load %arg5[%c6_233, %c0_234, %c0_235] : memref<8x32x4xbf16, #tpu.memory_space<vmem>>, vector<1x32x4xbf16>
      %329 = vector.shape_cast %328 : vector<1x32x4xbf16> to vector<32x4xbf16>
      %cst_236 = arith.constant dense<0.000000e+00> : vector<8x4xf32>
      %330 = tpu.matmul %236, %329, %cst_236 {dimension_numbers = #tpu.dot_dimension_numbers<[1], [0], [0], [1], [0, 0, 1, 1], [], []>} : vector<8x32xbf16>, vector<32x4xbf16>, vector<8x4xf32> -> vector<8x4xf32>
      %331 = arith.truncf %330 : vector<8x4xf32> to vector<8x4xbf16>
      %c6_237 = arith.constant 6 : index
      %c0_238 = arith.constant 0 : index
      %c0_239 = arith.constant 0 : index
      %332 = vector.load %arg10[%c6_237, %c0_238, %c0_239] : memref<8x8x4xbf16, #tpu.memory_space<vmem>>, vector<1x8x4xbf16>
      %333 = vector.shape_cast %332 : vector<1x8x4xbf16> to vector<8x4xbf16>
      %334 = vector.shape_cast %331 : vector<8x4xbf16> to vector<1x8x4xbf16>
      tpu.vector_store %arg10[%c6_237, %c0_238, %c0_239], %334 {strides = array<i32>} : memref<8x8x4xbf16, #tpu.memory_space<vmem>>, vector<1x8x4xbf16>,
      %c7_240 = arith.constant 7 : index
      %c0_241 = arith.constant 0 : index
      %c0_242 = arith.constant 0 : index
      %335 = vector.load %arg4[%c7_240, %c0_241, %c0_242] : memref<8x32x4xbf16, #tpu.memory_space<vmem>>, vector<1x32x4xbf16>
      %336 = vector.shape_cast %335 : vector<1x32x4xbf16> to vector<32x4xbf16>
      %cst_243 = arith.constant dense<0.000000e+00> : vector<8x4xf32>
      %337 = tpu.matmul %236, %336, %cst_243 {dimension_numbers = #tpu.dot_dimension_numbers<[1], [0], [0], [1], [0, 0, 1, 1], [], []>} : vector<8x32xbf16>, vector<32x4xbf16>, vector<8x4xf32> -> vector<8x4xf32>
      %338 = arith.truncf %337 : vector<8x4xf32> to vector<8x4xbf16>
      %c7_244 = arith.constant 7 : index
      %c0_245 = arith.constant 0 : index
      %c0_246 = arith.constant 0 : index
      %339 = vector.load %arg9[%c7_244, %c0_245, %c0_246] : memref<8x8x4xbf16, #tpu.memory_space<vmem>>, vector<1x8x4xbf16>
      %340 = vector.shape_cast %339 : vector<1x8x4xbf16> to vector<8x4xbf16>
      %341 = vector.shape_cast %338 : vector<8x4xbf16> to vector<1x8x4xbf16>
      tpu.vector_store %arg9[%c7_244, %c0_245, %c0_246], %341 {strides = array<i32>} : memref<8x8x4xbf16, #tpu.memory_space<vmem>>, vector<1x8x4xbf16>,
      %c7_247 = arith.constant 7 : index
      %c0_248 = arith.constant 0 : index
      %c0_249 = arith.constant 0 : index
      %342 = vector.load %arg5[%c7_247, %c0_248, %c0_249] : memref<8x32x4xbf16, #tpu.memory_space<vmem>>, vector<1x32x4xbf16>
      %343 = vector.shape_cast %342 : vector<1x32x4xbf16> to vector<32x4xbf16>
      %cst_250 = arith.constant dense<0.000000e+00> : vector<8x4xf32>
      %344 = tpu.matmul %236, %343, %cst_250 {dimension_numbers = #tpu.dot_dimension_numbers<[1], [0], [0], [1], [0, 0, 1, 1], [], []>} : vector<8x32xbf16>, vector<32x4xbf16>, vector<8x4xf32> -> vector<8x4xf32>
      %345 = arith.truncf %344 : vector<8x4xf32> to vector<8x4xbf16>
      %c7_251 = arith.constant 7 : index
      %c0_252 = arith.constant 0 : index
      %c0_253 = arith.constant 0 : index
      %346 = vector.load %arg10[%c7_251, %c0_252, %c0_253] : memref<8x8x4xbf16, #tpu.memory_space<vmem>>, vector<1x8x4xbf16>
      %347 = vector.shape_cast %346 : vector<1x8x4xbf16> to vector<8x4xbf16>
      %348 = vector.shape_cast %345 : vector<8x4xbf16> to vector<1x8x4xbf16>
      tpu.vector_store %arg10[%c7_251, %c0_252, %c0_253], %348 {strides = array<i32>} : memref<8x8x4xbf16, #tpu.memory_space<vmem>>, vector<1x8x4xbf16>,
    } else {
    }
    %c8_i32 = arith.constant 8 : i32
    %3 = arith.muli %arg1, %c8_i32 : i32
    %4 = tpu.assume_multiple %3, 8 : i32
    %c0 = arith.constant 0 : index
    %5 = arith.index_cast %4 : i32 to index
    %c0_1 = arith.constant 0 : index
    %6 = vector.load %arg2[%c0, %5, %c0_1] : memref<1x8x32xf32, #tpu.memory_space<vmem>>, vector<1x8x32xf32>
    %7 = vector.shape_cast %6 : vector<1x8x32xf32> to vector<8x32xf32>
    %c0_2 = arith.constant 0 : index
    %c0_3 = arith.constant 0 : index
    %8 = vector.load %arg6[%c0_2, %c0_3] : memref<1x32xf32, #tpu.memory_space<vmem>>, vector<1x32xf32>
    %c0_4 = arith.constant 0 : index
    %c0_5 = arith.constant 0 : index
    %9 = vector.load %arg7[%c0_4, %c0_5] : memref<1x32xf32, #tpu.memory_space<vmem>>, vector<1x32xf32>
    %cst = arith.constant dense<0.000000e+00> : vector<8xf32>
    %10 = vector.multi_reduction <add>, %7, %cst [1] : vector<8x32xf32> to vector<8xf32>
    %11 = vector.shape_cast %10 : vector<8xf32> to vector<8x1xf32>
    %cst_6 = arith.constant 3.200000e+01 : f32
    %12 = vector.broadcast %cst_6 : f32 to vector<8x1xf32>
    %13 = arith.divf %11, %12 : vector<8x1xf32>
    %14 = vector.broadcast %13 : vector<8x1xf32> to vector<8x32xf32>
    %15 = arith.subf %7, %14 : vector<8x32xf32>
    %16 = arith.mulf %15, %15 : vector<8x32xf32>
    %cst_7 = arith.constant dense<0.000000e+00> : vector<8xf32>
    %17 = vector.multi_reduction <add>, %16, %cst_7 [1] : vector<8x32xf32> to vector<8xf32>
    %18 = vector.shape_cast %17 : vector<8xf32> to vector<8x1xf32>
    %cst_8 = arith.constant 3.200000e+01 : f32
    %19 = vector.broadcast %cst_8 : f32 to vector<8x1xf32>
    %20 = arith.divf %18, %19 : vector<8x1xf32>
    %cst_9 = arith.constant 9.99999974E-6 : f32
    %21 = vector.broadcast %cst_9 : f32 to vector<8x1xf32>
    %22 = arith.addf %20, %21 : vector<8x1xf32>
    %23 = math.rsqrt %22 : vector<8x1xf32>
    %24 = vector.broadcast %23 : vector<8x1xf32> to vector<8x32xf32>
    %25 = arith.mulf %15, %24 : vector<8x32xf32>
    %26 = vector.broadcast %8 : vector<1x32xf32> to vector<8x32xf32>
    %27 = arith.mulf %25, %26 : vector<8x32xf32>
    %28 = vector.broadcast %9 : vector<1x32xf32> to vector<8x32xf32>
    %29 = arith.addf %27, %28 : vector<8x32xf32>
    %30 = arith.truncf %29 : vector<8x32xf32> to vector<8x32xbf16>
    %c0_10 = arith.constant 0 : index
    %c0_11 = arith.constant 0 : index
    %c0_12 = arith.constant 0 : index
    %31 = vector.load %arg3[%c0_10, %c0_11, %c0_12] : memref<8x32x4xbf16, #tpu.memory_space<vmem>>, vector<1x32x4xbf16>
    %32 = vector.shape_cast %31 : vector<1x32x4xbf16> to vector<32x4xbf16>
    %cst_13 = arith.constant dense<0.000000e+00> : vector<8x4xf32>
    %33 = tpu.matmul %30, %32, %cst_13 {dimension_numbers = #tpu.dot_dimension_numbers<[1], [0], [0], [1], [0, 0, 1, 1], [], []>} : vector<8x32xbf16>, vector<32x4xbf16>, vector<8x4xf32> -> vector<8x4xf32>
    %34 = arith.truncf %33 : vector<8x4xf32> to vector<8x4xbf16>
    %c0_14 = arith.constant 0 : index
    %c0_15 = arith.constant 0 : index
    %c0_16 = arith.constant 0 : index
    %35 = vector.load %arg9[%c0_14, %c0_15, %c0_16] : memref<8x8x4xbf16, #tpu.memory_space<vmem>>, vector<1x8x4xbf16>
    %36 = vector.shape_cast %35 : vector<1x8x4xbf16> to vector<8x4xbf16>
    %cst_17 = arith.constant dense<0.000000e+00> : vector<8x8xf32>
    %37 = tpu.matmul %34, %36, %cst_17 {dimension_numbers = #tpu.dot_dimension_numbers<[1], [1], [0], [0], [0, 0, 1, 0], [], []>} : vector<8x4xbf16>, vector<8x4xbf16>, vector<8x8xf32> -> vector<8x8xf32>
    %cst_18 = arith.constant dense<0xFF800000> : vector<8xf32>
    %38 = vector.multi_reduction <maximumf>, %37, %cst_18 [1] : vector<8x8xf32> to vector<8xf32>
    %39 = vector.shape_cast %38 : vector<8xf32> to vector<8x1xf32>
    %40 = vector.broadcast %39 : vector<8x1xf32> to vector<8x8xf32>
    %41 = arith.subf %37, %40 : vector<8x8xf32>
    %42 = math.exp %41 : vector<8x8xf32>
    %cst_19 = arith.constant dense<0.000000e+00> : vector<8xf32>
    %43 = vector.multi_reduction <add>, %42, %cst_19 [1] : vector<8x8xf32> to vector<8xf32>
    %44 = vector.shape_cast %43 : vector<8xf32> to vector<8x1xf32>
    %45 = arith.truncf %42 : vector<8x8xf32> to vector<8x8xbf16>
    %c0_20 = arith.constant 0 : index
    %c0_21 = arith.constant 0 : index
    %c0_22 = arith.constant 0 : index
    %46 = vector.load %arg10[%c0_20, %c0_21, %c0_22] : memref<8x8x4xbf16, #tpu.memory_space<vmem>>, vector<1x8x4xbf16>
    %47 = vector.shape_cast %46 : vector<1x8x4xbf16> to vector<8x4xbf16>
    %cst_23 = arith.constant dense<0.000000e+00> : vector<8x4xf32>
    %48 = tpu.matmul %45, %47, %cst_23 {dimension_numbers = #tpu.dot_dimension_numbers<[1], [0], [0], [1], [0, 0, 1, 1], [], []>} : vector<8x8xbf16>, vector<8x4xbf16>, vector<8x4xf32> -> vector<8x4xf32>
    %49 = tpu.reciprocal %44 : vector<8x1xf32> -> vector<8x1xf32>
    %50 = vector.broadcast %49 : vector<8x1xf32> to vector<8x4xf32>
    %51 = arith.mulf %48, %50 : vector<8x4xf32>
    %c0_24 = arith.constant 0 : index
    %c0_25 = arith.constant 0 : index
    %52 = vector.load %arg11[%c0_24, %c0_25] : memref<8x32xf32, #tpu.memory_space<vmem>>, vector<8x4xf32>
    tpu.vector_store %arg11[%c0_24, %c0_25], %51 {strides = array<i32>} : memref<8x32xf32, #tpu.memory_space<vmem>>, vector<8x4xf32>,
    %c1 = arith.constant 1 : index
    %c0_26 = arith.constant 0 : index
    %c0_27 = arith.constant 0 : index
    %53 = vector.load %arg3[%c1, %c0_26, %c0_27] : memref<8x32x4xbf16, #tpu.memory_space<vmem>>, vector<1x32x4xbf16>
    %54 = vector.shape_cast %53 : vector<1x32x4xbf16> to vector<32x4xbf16>
    %cst_28 = arith.constant dense<0.000000e+00> : vector<8x4xf32>
    %55 = tpu.matmul %30, %54, %cst_28 {dimension_numbers = #tpu.dot_dimension_numbers<[1], [0], [0], [1], [0, 0, 1, 1], [], []>} : vector<8x32xbf16>, vector<32x4xbf16>, vector<8x4xf32> -> vector<8x4xf32>
    %56 = arith.truncf %55 : vector<8x4xf32> to vector<8x4xbf16>
    %c1_29 = arith.constant 1 : index
    %c0_30 = arith.constant 0 : index
    %c0_31 = arith.constant 0 : index
    %57 = vector.load %arg9[%c1_29, %c0_30, %c0_31] : memref<8x8x4xbf16, #tpu.memory_space<vmem>>, vector<1x8x4xbf16>
    %58 = vector.shape_cast %57 : vector<1x8x4xbf16> to vector<8x4xbf16>
    %cst_32 = arith.constant dense<0.000000e+00> : vector<8x8xf32>
    %59 = tpu.matmul %56, %58, %cst_32 {dimension_numbers = #tpu.dot_dimension_numbers<[1], [1], [0], [0], [0, 0, 1, 0], [], []>} : vector<8x4xbf16>, vector<8x4xbf16>, vector<8x8xf32> -> vector<8x8xf32>
    %cst_33 = arith.constant dense<0xFF800000> : vector<8xf32>
    %60 = vector.multi_reduction <maximumf>, %59, %cst_33 [1] : vector<8x8xf32> to vector<8xf32>
    %61 = vector.shape_cast %60 : vector<8xf32> to vector<8x1xf32>
    %62 = vector.broadcast %61 : vector<8x1xf32> to vector<8x8xf32>
    %63 = arith.subf %59, %62 : vector<8x8xf32>
    %64 = math.exp %63 : vector<8x8xf32>
    %cst_34 = arith.constant dense<0.000000e+00> : vector<8xf32>
    %65 = vector.multi_reduction <add>, %64, %cst_34 [1] : vector<8x8xf32> to vector<8xf32>
    %66 = vector.shape_cast %65 : vector<8xf32> to vector<8x1xf32>
    %67 = arith.truncf %64 : vector<8x8xf32> to vector<8x8xbf16>
    %c1_35 = arith.constant 1 : index
    %c0_36 = arith.constant 0 : index
    %c0_37 = arith.constant 0 : index
    %68 = vector.load %arg10[%c1_35, %c0_36, %c0_37] : memref<8x8x4xbf16, #tpu.memory_space<vmem>>, vector<1x8x4xbf16>
    %69 = vector.shape_cast %68 : vector<1x8x4xbf16> to vector<8x4xbf16>
    %cst_38 = arith.constant dense<0.000000e+00> : vector<8x4xf32>
    %70 = tpu.matmul %67, %69, %cst_38 {dimension_numbers = #tpu.dot_dimension_numbers<[1], [0], [0], [1], [0, 0, 1, 1], [], []>} : vector<8x8xbf16>, vector<8x4xbf16>, vector<8x4xf32> -> vector<8x4xf32>
    %71 = tpu.reciprocal %66 : vector<8x1xf32> -> vector<8x1xf32>
    %72 = vector.broadcast %71 : vector<8x1xf32> to vector<8x4xf32>
    %73 = arith.mulf %70, %72 : vector<8x4xf32>
    %c0_39 = arith.constant 0 : index
    %c4 = arith.constant 4 : index
    %74 = vector.load %arg11[%c0_39, %c4] : memref<8x32xf32, #tpu.memory_space<vmem>>, vector<8x4xf32>
    tpu.vector_store %arg11[%c0_39, %c4], %73 {strides = array<i32>} : memref<8x32xf32, #tpu.memory_space<vmem>>, vector<8x4xf32>,
    %c2 = arith.constant 2 : index
    %c0_40 = arith.constant 0 : index
    %c0_41 = arith.constant 0 : index
    %75 = vector.load %arg3[%c2, %c0_40, %c0_41] : memref<8x32x4xbf16, #tpu.memory_space<vmem>>, vector<1x32x4xbf16>
    %76 = vector.shape_cast %75 : vector<1x32x4xbf16> to vector<32x4xbf16>
    %cst_42 = arith.constant dense<0.000000e+00> : vector<8x4xf32>
    %77 = tpu.matmul %30, %76, %cst_42 {dimension_numbers = #tpu.dot_dimension_numbers<[1], [0], [0], [1], [0, 0, 1, 1], [], []>} : vector<8x32xbf16>, vector<32x4xbf16>, vector<8x4xf32> -> vector<8x4xf32>
    %78 = arith.truncf %77 : vector<8x4xf32> to vector<8x4xbf16>
    %c2_43 = arith.constant 2 : index
    %c0_44 = arith.constant 0 : index
    %c0_45 = arith.constant 0 : index
    %79 = vector.load %arg9[%c2_43, %c0_44, %c0_45] : memref<8x8x4xbf16, #tpu.memory_space<vmem>>, vector<1x8x4xbf16>
    %80 = vector.shape_cast %79 : vector<1x8x4xbf16> to vector<8x4xbf16>
    %cst_46 = arith.constant dense<0.000000e+00> : vector<8x8xf32>
    %81 = tpu.matmul %78, %80, %cst_46 {dimension_numbers = #tpu.dot_dimension_numbers<[1], [1], [0], [0], [0, 0, 1, 0], [], []>} : vector<8x4xbf16>, vector<8x4xbf16>, vector<8x8xf32> -> vector<8x8xf32>
    %cst_47 = arith.constant dense<0xFF800000> : vector<8xf32>
    %82 = vector.multi_reduction <maximumf>, %81, %cst_47 [1] : vector<8x8xf32> to vector<8xf32>
    %83 = vector.shape_cast %82 : vector<8xf32> to vector<8x1xf32>
    %84 = vector.broadcast %83 : vector<8x1xf32> to vector<8x8xf32>
    %85 = arith.subf %81, %84 : vector<8x8xf32>
    %86 = math.exp %85 : vector<8x8xf32>
    %cst_48 = arith.constant dense<0.000000e+00> : vector<8xf32>
    %87 = vector.multi_reduction <add>, %86, %cst_48 [1] : vector<8x8xf32> to vector<8xf32>
    %88 = vector.shape_cast %87 : vector<8xf32> to vector<8x1xf32>
    %89 = arith.truncf %86 : vector<8x8xf32> to vector<8x8xbf16>
    %c2_49 = arith.constant 2 : index
    %c0_50 = arith.constant 0 : index
    %c0_51 = arith.constant 0 : index
    %90 = vector.load %arg10[%c2_49, %c0_50, %c0_51] : memref<8x8x4xbf16, #tpu.memory_space<vmem>>, vector<1x8x4xbf16>
    %91 = vector.shape_cast %90 : vector<1x8x4xbf16> to vector<8x4xbf16>
    %cst_52 = arith.constant dense<0.000000e+00> : vector<8x4xf32>
    %92 = tpu.matmul %89, %91, %cst_52 {dimension_numbers = #tpu.dot_dimension_numbers<[1], [0], [0], [1], [0, 0, 1, 1], [], []>} : vector<8x8xbf16>, vector<8x4xbf16>, vector<8x4xf32> -> vector<8x4xf32>
    %93 = tpu.reciprocal %88 : vector<8x1xf32> -> vector<8x1xf32>
    %94 = vector.broadcast %93 : vector<8x1xf32> to vector<8x4xf32>
    %95 = arith.mulf %92, %94 : vector<8x4xf32>
    %c0_53 = arith.constant 0 : index
    %c8 = arith.constant 8 : index
    %96 = vector.load %arg11[%c0_53, %c8] : memref<8x32xf32, #tpu.memory_space<vmem>>, vector<8x4xf32>
    tpu.vector_store %arg11[%c0_53, %c8], %95 {strides = array<i32>} : memref<8x32xf32, #tpu.memory_space<vmem>>, vector<8x4xf32>,
    %c3 = arith.constant 3 : index
    %c0_54 = arith.constant 0 : index
    %c0_55 = arith.constant 0 : index
    %97 = vector.load %arg3[%c3, %c0_54, %c0_55] : memref<8x32x4xbf16, #tpu.memory_space<vmem>>, vector<1x32x4xbf16>
    %98 = vector.shape_cast %97 : vector<1x32x4xbf16> to vector<32x4xbf16>
    %cst_56 = arith.constant dense<0.000000e+00> : vector<8x4xf32>
    %99 = tpu.matmul %30, %98, %cst_56 {dimension_numbers = #tpu.dot_dimension_numbers<[1], [0], [0], [1], [0, 0, 1, 1], [], []>} : vector<8x32xbf16>, vector<32x4xbf16>, vector<8x4xf32> -> vector<8x4xf32>
    %100 = arith.truncf %99 : vector<8x4xf32> to vector<8x4xbf16>
    %c3_57 = arith.constant 3 : index
    %c0_58 = arith.constant 0 : index
    %c0_59 = arith.constant 0 : index
    %101 = vector.load %arg9[%c3_57, %c0_58, %c0_59] : memref<8x8x4xbf16, #tpu.memory_space<vmem>>, vector<1x8x4xbf16>
    %102 = vector.shape_cast %101 : vector<1x8x4xbf16> to vector<8x4xbf16>
    %cst_60 = arith.constant dense<0.000000e+00> : vector<8x8xf32>
    %103 = tpu.matmul %100, %102, %cst_60 {dimension_numbers = #tpu.dot_dimension_numbers<[1], [1], [0], [0], [0, 0, 1, 0], [], []>} : vector<8x4xbf16>, vector<8x4xbf16>, vector<8x8xf32> -> vector<8x8xf32>
    %cst_61 = arith.constant dense<0xFF800000> : vector<8xf32>
    %104 = vector.multi_reduction <maximumf>, %103, %cst_61 [1] : vector<8x8xf32> to vector<8xf32>
    %105 = vector.shape_cast %104 : vector<8xf32> to vector<8x1xf32>
    %106 = vector.broadcast %105 : vector<8x1xf32> to vector<8x8xf32>
    %107 = arith.subf %103, %106 : vector<8x8xf32>
    %108 = math.exp %107 : vector<8x8xf32>
    %cst_62 = arith.constant dense<0.000000e+00> : vector<8xf32>
    %109 = vector.multi_reduction <add>, %108, %cst_62 [1] : vector<8x8xf32> to vector<8xf32>
    %110 = vector.shape_cast %109 : vector<8xf32> to vector<8x1xf32>
    %111 = arith.truncf %108 : vector<8x8xf32> to vector<8x8xbf16>
    %c3_63 = arith.constant 3 : index
    %c0_64 = arith.constant 0 : index
    %c0_65 = arith.constant 0 : index
    %112 = vector.load %arg10[%c3_63, %c0_64, %c0_65] : memref<8x8x4xbf16, #tpu.memory_space<vmem>>, vector<1x8x4xbf16>
    %113 = vector.shape_cast %112 : vector<1x8x4xbf16> to vector<8x4xbf16>
    %cst_66 = arith.constant dense<0.000000e+00> : vector<8x4xf32>
    %114 = tpu.matmul %111, %113, %cst_66 {dimension_numbers = #tpu.dot_dimension_numbers<[1], [0], [0], [1], [0, 0, 1, 1], [], []>} : vector<8x8xbf16>, vector<8x4xbf16>, vector<8x4xf32> -> vector<8x4xf32>
    %115 = tpu.reciprocal %110 : vector<8x1xf32> -> vector<8x1xf32>
    %116 = vector.broadcast %115 : vector<8x1xf32> to vector<8x4xf32>
    %117 = arith.mulf %114, %116 : vector<8x4xf32>
    %c0_67 = arith.constant 0 : index
    %c12 = arith.constant 12 : index
    %118 = vector.load %arg11[%c0_67, %c12] : memref<8x32xf32, #tpu.memory_space<vmem>>, vector<8x4xf32>
    tpu.vector_store %arg11[%c0_67, %c12], %117 {strides = array<i32>} : memref<8x32xf32, #tpu.memory_space<vmem>>, vector<8x4xf32>,
    %c4_68 = arith.constant 4 : index
    %c0_69 = arith.constant 0 : index
    %c0_70 = arith.constant 0 : index
    %119 = vector.load %arg3[%c4_68, %c0_69, %c0_70] : memref<8x32x4xbf16, #tpu.memory_space<vmem>>, vector<1x32x4xbf16>
    %120 = vector.shape_cast %119 : vector<1x32x4xbf16> to vector<32x4xbf16>
    %cst_71 = arith.constant dense<0.000000e+00> : vector<8x4xf32>
    %121 = tpu.matmul %30, %120, %cst_71 {dimension_numbers = #tpu.dot_dimension_numbers<[1], [0], [0], [1], [0, 0, 1, 1], [], []>} : vector<8x32xbf16>, vector<32x4xbf16>, vector<8x4xf32> -> vector<8x4xf32>
    %122 = arith.truncf %121 : vector<8x4xf32> to vector<8x4xbf16>
    %c4_72 = arith.constant 4 : index
    %c0_73 = arith.constant 0 : index
    %c0_74 = arith.constant 0 : index
    %123 = vector.load %arg9[%c4_72, %c0_73, %c0_74] : memref<8x8x4xbf16, #tpu.memory_space<vmem>>, vector<1x8x4xbf16>
    %124 = vector.shape_cast %123 : vector<1x8x4xbf16> to vector<8x4xbf16>
    %cst_75 = arith.constant dense<0.000000e+00> : vector<8x8xf32>
    %125 = tpu.matmul %122, %124, %cst_75 {dimension_numbers = #tpu.dot_dimension_numbers<[1], [1], [0], [0], [0, 0, 1, 0], [], []>} : vector<8x4xbf16>, vector<8x4xbf16>, vector<8x8xf32> -> vector<8x8xf32>
    %cst_76 = arith.constant dense<0xFF800000> : vector<8xf32>
    %126 = vector.multi_reduction <maximumf>, %125, %cst_76 [1] : vector<8x8xf32> to vector<8xf32>
    %127 = vector.shape_cast %126 : vector<8xf32> to vector<8x1xf32>
    %128 = vector.broadcast %127 : vector<8x1xf32> to vector<8x8xf32>
    %129 = arith.subf %125, %128 : vector<8x8xf32>
    %130 = math.exp %129 : vector<8x8xf32>
    %cst_77 = arith.constant dense<0.000000e+00> : vector<8xf32>
    %131 = vector.multi_reduction <add>, %130, %cst_77 [1] : vector<8x8xf32> to vector<8xf32>
    %132 = vector.shape_cast %131 : vector<8xf32> to vector<8x1xf32>
    %133 = arith.truncf %130 : vector<8x8xf32> to vector<8x8xbf16>
    %c4_78 = arith.constant 4 : index
    %c0_79 = arith.constant 0 : index
    %c0_80 = arith.constant 0 : index
    %134 = vector.load %arg10[%c4_78, %c0_79, %c0_80] : memref<8x8x4xbf16, #tpu.memory_space<vmem>>, vector<1x8x4xbf16>
    %135 = vector.shape_cast %134 : vector<1x8x4xbf16> to vector<8x4xbf16>
    %cst_81 = arith.constant dense<0.000000e+00> : vector<8x4xf32>
    %136 = tpu.matmul %133, %135, %cst_81 {dimension_numbers = #tpu.dot_dimension_numbers<[1], [0], [0], [1], [0, 0, 1, 1], [], []>} : vector<8x8xbf16>, vector<8x4xbf16>, vector<8x4xf32> -> vector<8x4xf32>
    %137 = tpu.reciprocal %132 : vector<8x1xf32> -> vector<8x1xf32>
    %138 = vector.broadcast %137 : vector<8x1xf32> to vector<8x4xf32>
    %139 = arith.mulf %136, %138 : vector<8x4xf32>
    %c0_82 = arith.constant 0 : index
    %c16 = arith.constant 16 : index
    %140 = vector.load %arg11[%c0_82, %c16] : memref<8x32xf32, #tpu.memory_space<vmem>>, vector<8x4xf32>
    tpu.vector_store %arg11[%c0_82, %c16], %139 {strides = array<i32>} : memref<8x32xf32, #tpu.memory_space<vmem>>, vector<8x4xf32>,
    %c5 = arith.constant 5 : index
    %c0_83 = arith.constant 0 : index
    %c0_84 = arith.constant 0 : index
    %141 = vector.load %arg3[%c5, %c0_83, %c0_84] : memref<8x32x4xbf16, #tpu.memory_space<vmem>>, vector<1x32x4xbf16>
    %142 = vector.shape_cast %141 : vector<1x32x4xbf16> to vector<32x4xbf16>
    %cst_85 = arith.constant dense<0.000000e+00> : vector<8x4xf32>
    %143 = tpu.matmul %30, %142, %cst_85 {dimension_numbers = #tpu.dot_dimension_numbers<[1], [0], [0], [1], [0, 0, 1, 1], [], []>} : vector<8x32xbf16>, vector<32x4xbf16>, vector<8x4xf32> -> vector<8x4xf32>
    %144 = arith.truncf %143 : vector<8x4xf32> to vector<8x4xbf16>
    %c5_86 = arith.constant 5 : index
    %c0_87 = arith.constant 0 : index
    %c0_88 = arith.constant 0 : index
    %145 = vector.load %arg9[%c5_86, %c0_87, %c0_88] : memref<8x8x4xbf16, #tpu.memory_space<vmem>>, vector<1x8x4xbf16>
    %146 = vector.shape_cast %145 : vector<1x8x4xbf16> to vector<8x4xbf16>
    %cst_89 = arith.constant dense<0.000000e+00> : vector<8x8xf32>
    %147 = tpu.matmul %144, %146, %cst_89 {dimension_numbers = #tpu.dot_dimension_numbers<[1], [1], [0], [0], [0, 0, 1, 0], [], []>} : vector<8x4xbf16>, vector<8x4xbf16>, vector<8x8xf32> -> vector<8x8xf32>
    %cst_90 = arith.constant dense<0xFF800000> : vector<8xf32>
    %148 = vector.multi_reduction <maximumf>, %147, %cst_90 [1] : vector<8x8xf32> to vector<8xf32>
    %149 = vector.shape_cast %148 : vector<8xf32> to vector<8x1xf32>
    %150 = vector.broadcast %149 : vector<8x1xf32> to vector<8x8xf32>
    %151 = arith.subf %147, %150 : vector<8x8xf32>
    %152 = math.exp %151 : vector<8x8xf32>
    %cst_91 = arith.constant dense<0.000000e+00> : vector<8xf32>
    %153 = vector.multi_reduction <add>, %152, %cst_91 [1] : vector<8x8xf32> to vector<8xf32>
    %154 = vector.shape_cast %153 : vector<8xf32> to vector<8x1xf32>
    %155 = arith.truncf %152 : vector<8x8xf32> to vector<8x8xbf16>
    %c5_92 = arith.constant 5 : index
    %c0_93 = arith.constant 0 : index
    %c0_94 = arith.constant 0 : index
    %156 = vector.load %arg10[%c5_92, %c0_93, %c0_94] : memref<8x8x4xbf16, #tpu.memory_space<vmem>>, vector<1x8x4xbf16>
    %157 = vector.shape_cast %156 : vector<1x8x4xbf16> to vector<8x4xbf16>
    %cst_95 = arith.constant dense<0.000000e+00> : vector<8x4xf32>
    %158 = tpu.matmul %155, %157, %cst_95 {dimension_numbers = #tpu.dot_dimension_numbers<[1], [0], [0], [1], [0, 0, 1, 1], [], []>} : vector<8x8xbf16>, vector<8x4xbf16>, vector<8x4xf32> -> vector<8x4xf32>
    %159 = tpu.reciprocal %154 : vector<8x1xf32> -> vector<8x1xf32>
    %160 = vector.broadcast %159 : vector<8x1xf32> to vector<8x4xf32>
    %161 = arith.mulf %158, %160 : vector<8x4xf32>
    %c0_96 = arith.constant 0 : index
    %c20 = arith.constant 20 : index
    %162 = vector.load %arg11[%c0_96, %c20] : memref<8x32xf32, #tpu.memory_space<vmem>>, vector<8x4xf32>
    tpu.vector_store %arg11[%c0_96, %c20], %161 {strides = array<i32>} : memref<8x32xf32, #tpu.memory_space<vmem>>, vector<8x4xf32>,
    %c6 = arith.constant 6 : index
    %c0_97 = arith.constant 0 : index
    %c0_98 = arith.constant 0 : index
    %163 = vector.load %arg3[%c6, %c0_97, %c0_98] : memref<8x32x4xbf16, #tpu.memory_space<vmem>>, vector<1x32x4xbf16>
    %164 = vector.shape_cast %163 : vector<1x32x4xbf16> to vector<32x4xbf16>
    %cst_99 = arith.constant dense<0.000000e+00> : vector<8x4xf32>
    %165 = tpu.matmul %30, %164, %cst_99 {dimension_numbers = #tpu.dot_dimension_numbers<[1], [0], [0], [1], [0, 0, 1, 1], [], []>} : vector<8x32xbf16>, vector<32x4xbf16>, vector<8x4xf32> -> vector<8x4xf32>
    %166 = arith.truncf %165 : vector<8x4xf32> to vector<8x4xbf16>
    %c6_100 = arith.constant 6 : index
    %c0_101 = arith.constant 0 : index
    %c0_102 = arith.constant 0 : index
    %167 = vector.load %arg9[%c6_100, %c0_101, %c0_102] : memref<8x8x4xbf16, #tpu.memory_space<vmem>>, vector<1x8x4xbf16>
    %168 = vector.shape_cast %167 : vector<1x8x4xbf16> to vector<8x4xbf16>
    %cst_103 = arith.constant dense<0.000000e+00> : vector<8x8xf32>
    %169 = tpu.matmul %166, %168, %cst_103 {dimension_numbers = #tpu.dot_dimension_numbers<[1], [1], [0], [0], [0, 0, 1, 0], [], []>} : vector<8x4xbf16>, vector<8x4xbf16>, vector<8x8xf32> -> vector<8x8xf32>
    %cst_104 = arith.constant dense<0xFF800000> : vector<8xf32>
    %170 = vector.multi_reduction <maximumf>, %169, %cst_104 [1] : vector<8x8xf32> to vector<8xf32>
    %171 = vector.shape_cast %170 : vector<8xf32> to vector<8x1xf32>
    %172 = vector.broadcast %171 : vector<8x1xf32> to vector<8x8xf32>
    %173 = arith.subf %169, %172 : vector<8x8xf32>
    %174 = math.exp %173 : vector<8x8xf32>
    %cst_105 = arith.constant dense<0.000000e+00> : vector<8xf32>
    %175 = vector.multi_reduction <add>, %174, %cst_105 [1] : vector<8x8xf32> to vector<8xf32>
    %176 = vector.shape_cast %175 : vector<8xf32> to vector<8x1xf32>
    %177 = arith.truncf %174 : vector<8x8xf32> to vector<8x8xbf16>
    %c6_106 = arith.constant 6 : index
    %c0_107 = arith.constant 0 : index
    %c0_108 = arith.constant 0 : index
    %178 = vector.load %arg10[%c6_106, %c0_107, %c0_108] : memref<8x8x4xbf16, #tpu.memory_space<vmem>>, vector<1x8x4xbf16>
    %179 = vector.shape_cast %178 : vector<1x8x4xbf16> to vector<8x4xbf16>
    %cst_109 = arith.constant dense<0.000000e+00> : vector<8x4xf32>
    %180 = tpu.matmul %177, %179, %cst_109 {dimension_numbers = #tpu.dot_dimension_numbers<[1], [0], [0], [1], [0, 0, 1, 1], [], []>} : vector<8x8xbf16>, vector<8x4xbf16>, vector<8x4xf32> -> vector<8x4xf32>
    %181 = tpu.reciprocal %176 : vector<8x1xf32> -> vector<8x1xf32>
    %182 = vector.broadcast %181 : vector<8x1xf32> to vector<8x4xf32>
    %183 = arith.mulf %180, %182 : vector<8x4xf32>
    %c0_110 = arith.constant 0 : index
    %c24 = arith.constant 24 : index
    %184 = vector.load %arg11[%c0_110, %c24] : memref<8x32xf32, #tpu.memory_space<vmem>>, vector<8x4xf32>
    tpu.vector_store %arg11[%c0_110, %c24], %183 {strides = array<i32>} : memref<8x32xf32, #tpu.memory_space<vmem>>, vector<8x4xf32>,
    %c7 = arith.constant 7 : index
    %c0_111 = arith.constant 0 : index
    %c0_112 = arith.constant 0 : index
    %185 = vector.load %arg3[%c7, %c0_111, %c0_112] : memref<8x32x4xbf16, #tpu.memory_space<vmem>>, vector<1x32x4xbf16>
    %186 = vector.shape_cast %185 : vector<1x32x4xbf16> to vector<32x4xbf16>
    %cst_113 = arith.constant dense<0.000000e+00> : vector<8x4xf32>
    %187 = tpu.matmul %30, %186, %cst_113 {dimension_numbers = #tpu.dot_dimension_numbers<[1], [0], [0], [1], [0, 0, 1, 1], [], []>} : vector<8x32xbf16>, vector<32x4xbf16>, vector<8x4xf32> -> vector<8x4xf32>
    %188 = arith.truncf %187 : vector<8x4xf32> to vector<8x4xbf16>
    %c7_114 = arith.constant 7 : index
    %c0_115 = arith.constant 0 : index
    %c0_116 = arith.constant 0 : index
    %189 = vector.load %arg9[%c7_114, %c0_115, %c0_116] : memref<8x8x4xbf16, #tpu.memory_space<vmem>>, vector<1x8x4xbf16>
    %190 = vector.shape_cast %189 : vector<1x8x4xbf16> to vector<8x4xbf16>
    %cst_117 = arith.constant dense<0.000000e+00> : vector<8x8xf32>
    %191 = tpu.matmul %188, %190, %cst_117 {dimension_numbers = #tpu.dot_dimension_numbers<[1], [1], [0], [0], [0, 0, 1, 0], [], []>} : vector<8x4xbf16>, vector<8x4xbf16>, vector<8x8xf32> -> vector<8x8xf32>
    %cst_118 = arith.constant dense<0xFF800000> : vector<8xf32>
    %192 = vector.multi_reduction <maximumf>, %191, %cst_118 [1] : vector<8x8xf32> to vector<8xf32>
    %193 = vector.shape_cast %192 : vector<8xf32> to vector<8x1xf32>
    %194 = vector.broadcast %193 : vector<8x1xf32> to vector<8x8xf32>
    %195 = arith.subf %191, %194 : vector<8x8xf32>
    %196 = math.exp %195 : vector<8x8xf32>
    %cst_119 = arith.constant dense<0.000000e+00> : vector<8xf32>
    %197 = vector.multi_reduction <add>, %196, %cst_119 [1] : vector<8x8xf32> to vector<8xf32>
    %198 = vector.shape_cast %197 : vector<8xf32> to vector<8x1xf32>
    %199 = arith.truncf %196 : vector<8x8xf32> to vector<8x8xbf16>
    %c7_120 = arith.constant 7 : index
    %c0_121 = arith.constant 0 : index
    %c0_122 = arith.constant 0 : index
    %200 = vector.load %arg10[%c7_120, %c0_121, %c0_122] : memref<8x8x4xbf16, #tpu.memory_space<vmem>>, vector<1x8x4xbf16>
    %201 = vector.shape_cast %200 : vector<1x8x4xbf16> to vector<8x4xbf16>
    %cst_123 = arith.constant dense<0.000000e+00> : vector<8x4xf32>
    %202 = tpu.matmul %199, %201, %cst_123 {dimension_numbers = #tpu.dot_dimension_numbers<[1], [0], [0], [1], [0, 0, 1, 1], [], []>} : vector<8x8xbf16>, vector<8x4xbf16>, vector<8x4xf32> -> vector<8x4xf32>
    %203 = tpu.reciprocal %198 : vector<8x1xf32> -> vector<8x1xf32>
    %204 = vector.broadcast %203 : vector<8x1xf32> to vector<8x4xf32>
    %205 = arith.mulf %202, %204 : vector<8x4xf32>
    %c0_124 = arith.constant 0 : index
    %c28 = arith.constant 28 : index
    %206 = vector.load %arg11[%c0_124, %c28] : memref<8x32xf32, #tpu.memory_space<vmem>>, vector<8x4xf32>
    tpu.vector_store %arg11[%c0_124, %c28], %205 {strides = array<i32>} : memref<8x32xf32, #tpu.memory_space<vmem>>, vector<8x4xf32>,
    %c0_125 = arith.constant 0 : index
    %c0_126 = arith.constant 0 : index
    %207 = vector.load %arg11[%c0_125, %c0_126] : memref<8x32xf32, #tpu.memory_space<vmem>>, vector<8x32xf32>
    %208 = arith.addf %207, %29 : vector<8x32xf32>
    %c0_127 = arith.constant 0 : index
    %c0_128 = arith.constant 0 : index
    %c0_129 = arith.constant 0 : index
    %209 = vector.load %arg8[%c0_127, %c0_128, %c0_129] : memref<1x8x32xf32, #tpu.memory_space<vmem>>, vector<1x8x32xf32>
    %210 = vector.shape_cast %209 : vector<1x8x32xf32> to vector<8x32xf32>
    %211 = vector.shape_cast %208 : vector<8x32xf32> to vector<1x8x32xf32>
    tpu.vector_store %arg8[%c0_127, %c0_128, %c0_129], %211 {strides = array<i32>} : memref<1x8x32xf32, #tpu.memory_space<vmem>>, vector<1x8x32xf32>,
    return
  }
  func.func @transform_0(%arg0: i32, %arg1: i32) -> (i32, i32, i32) {
    %c0_i32 = arith.constant 0 : i32
    %c0_i32_0 = arith.constant 0 : i32
    %c0_i32_1 = arith.constant 0 : i32
    return %arg0, %c0_i32, %c0_i32_0 : i32, i32, i32
  }
  func.func @transform_1(%arg0: i32, %arg1: i32) -> (i32, i32, i32) {
    %c0_i32 = arith.constant 0 : i32
    %c0_i32_0 = arith.constant 0 : i32
    %c0_i32_1 = arith.constant 0 : i32
    %c0_i32_2 = arith.constant 0 : i32
    return %c0_i32, %c0_i32_0, %c0_i32_1 : i32, i32, i32
  }
  func.func @transform_2(%arg0: i32, %arg1: i32) -> (i32, i32, i32) {
    %c0_i32 = arith.constant 0 : i32
    %c0_i32_0 = arith.constant 0 : i32
    %c0_i32_1 = arith.constant 0 : i32
    %c0_i32_2 = arith.constant 0 : i32
    return %c0_i32, %c0_i32_0, %c0_i32_1 : i32, i32, i32
  }
  func.func @transform_3(%arg0: i32, %arg1: i32) -> (i32, i32, i32) {
    %c0_i32 = arith.constant 0 : i32
    %c0_i32_0 = arith.constant 0 : i32
    %c0_i32_1 = arith.constant 0 : i32
    %c0_i32_2 = arith.constant 0 : i32
    return %c0_i32, %c0_i32_0, %c0_i32_1 : i32, i32, i32
  }
  func.func @transform_4(%arg0: i32, %arg1: i32) -> (i32, i32) {
    %c0_i32 = arith.constant 0 : i32
    %c0_i32_0 = arith.constant 0 : i32
    %c0_i32_1 = arith.constant 0 : i32
    return %c0_i32, %c0_i32_0 : i32, i32
  }
  func.func @transform_5(%arg0: i32, %arg1: i32) -> (i32, i32) {
    %c0_i32 = arith.constant 0 : i32
    %c0_i32_0 = arith.constant 0 : i32
    %c0_i32_1 = arith.constant 0 : i32
    return %c0_i32, %c0_i32_0 : i32, i32
  }
  func.func @transform_6(%arg0: i32, %arg1: i32) -> (i32, i32, i32) {
    %c0_i32 = arith.constant 0 : i32
    %c0_i32_0 = arith.constant 0 : i32
    return %arg0, %arg1, %c0_i32 : i32, i32, i32
  }
}

</mosaic_0001>

<bundles_post_ra>
// kernel: tpu_custom_call.1
= control target key start
LH: loop header
LB: loop body
LE: loop exit
PB: predicated region body
PF: predicated region fallthrough
CT: control target
= control target key end

     0   :  { %11 = vsyncpa [#allocation6], 0  ;;  %s4176_s0 = inlined_call_operand.vmem [shape: f32[2,8,32], index: 0, kind: input, shape index: {}]   ;;  %s4177_s1 = inlined_call_operand.vmem [shape: bf16[8,32,4], index: 1, kind: input, shape index: {}]   ;;  %s4178_s2 = inlined_call_operand.vmem [shape: bf16[8,32,4], index: 2, kind: input, shape index: {}]   ;;  %s4179_s3 = inlined_call_operand.vmem [shape: bf16[8,32,4], index: 3, kind: input, shape index: {}]   ;;  %s4180_s4 = inlined_call_operand.vmem [shape: f32[1,32], index: 4, kind: input, shape index: {}]   ;;  %s4181_s5 = inlined_call_operand.vmem [shape: f32[1,32], index: 5, kind: input, shape index: {}]   ;;  %s4182_s6 = inlined_call_operand.hbm [shape: f32[2,8,32], index: 6, kind: output, shape index: {}]  }
   0x1   :  { %13 = vsyncpa [#allocation6 + $0x1], 0  ;;  %s3606_s21 = smov 0   ;;  %s3608_s22 = smov 0  }
   0x2   :  { %s3610_s23 = smov 0   ;;  %s3612_s24 = smov 0  }
   0x3   :  { %s3614_s25 = smov 0   ;;  %s3616_s26 = smov 0  }
   0x4 LB: > { %s2756_s27 = sadd.s32 4294967295, %s3559_s26   ;;  %s2757_s28 = sadd.s32 4294967294, %s3559_s26   ;;  %s3559_s26 = sphi %s3616_s26, %s19_s26   ;;  %s3555_s25 = sphi %s3614_s25, %s4189_s25   ;;  %s3551_s24 = sphi %s3612_s24, %s4188_s24   ;;  %s3547_s23 = sphi %s3610_s23, %s4187_s23   ;;  %s3543_s22 = sphi %s3608_s22, %s4186_s22   ;;  %s3539_s21 = sphi %s3606_s21, %s4185_s21  }
   0x5   : > { %s31_s29 = sadd.s32 1, %s3555_s25  ;;  %s171_s30 = sadd.s32 1, %s3547_s23 }
   0x6   : > { %p33_p0 = scmp.ge.s32.totalorder %s31_s29, 2  ;;  %p181_p1 = scmp.ne.s32.totalorder %s3547_s23, %s3543_s22 }
   0x7   : > { %p182_p2 = scmp.eq.s32.totalorder %s2756_s27, 1  ;;  %p187_p3 = scmp.ne.s32.totalorder %s3543_s22, %s3539_s21 }
   0x8   : > { %s4191_s29 = smov (%p33_p0, %s31_s29), 0  ;;  %p188_p5 = scmp.eq.s32.totalorder %s2757_s28, 1 }
   0x9   : > { %p3646_p4 = por %p182_p2, %p181_p1  ;;  %s166_s8 = ssub.s32 %s3555_s25, %s4191_s29 }
   0xa   : > { %p2760_p6 = scmp.ge.s32.totalorder %s3559_s26, 1  ;;  %p169_p7 = scmp.eq.s32.totalorder %s166_s8, 0 }
   0xb   : > { %p3653_p8 = por %p188_p5, %p187_p3  ;;  %p228_p9 = scmp.lt.s32.totalorder %s3559_s26, 3 }
   0xc   : > { %s3659_s10 = scalar_select %p169_p7, %s3547_s23, %s171_s30  }
   0xd   : > { %p229_p10 = pnand %p2760_p6, %p228_p9 }
   0xe   : > { %p257_p11 = scmp.lt.s32.totalorder (!%p229_p10), %s3551_s24, 1  ;;  %s3563_s18 = smov (!%p229_p10), 4  }
   0xf   : > { %232 = sbr.rel (%p229_p10) target bundleno = 3799 (0xed7), region = 44  ;;  %s3564_s19 = smov (!%p229_p10), 8  }
  0x10   : > { %s3565_s20 = smov (!%p229_p10), 16   ;;  %s3566_s27 = smov (!%p229_p10), 12  }
  0x11   : > { %s3567_s28 = smov (!%p229_p10), 20   ;;  %s3568_s30 = smov (!%p229_p10), 24  }
  0x12   : > { %s3569_s8 = smov (!%p229_p10), 28   ;;  %s2940_s13 = sshll.u32 (!%p229_p10), %s3551_s24, 7 }
  0x14   : > { %s258_s11 = scalar_select %p257_p11, %s3551_s24, 1  ;;  %vm269_vm0 = vcmask 261120   ;;  %v3399_v12 = vld [vmem:[%s4178_s2 + $0x8] sm:$0xff]   ;;  %v3561_v14 = vmov 0.0   ;;  %v3401_v15 = vld [vmem:[%s4178_s2] sm:$0xff]   ;;  %vm3562_vm1 = vmmov 0  }
  0x15   : > { %v3400_v13 = vld [vmem:[%s4179_s3 + $0x8] sm:$0xff]   ;;  %3047 = vmatprep.subr.bf16.mxu0 %v3561_v14  ;;  %3055 = vmatprep.subr.bf16.mxu1 %v3561_v14  ;;  %v3402_v16 = vld [vmem:[%s4179_s3] sm:$0xff]   ;;  %v3403_v31 = vld [vmem:[%s4178_s2 + $0x18] sm:$0xff]   ;;  %vm359_vm2 = vcmask 27648   ;;  %vm1355_vm3 = vcmask 31744   ;;  %vm1417_vm4 = vcmask 1043456  }
  0x16   : > { %s2762_s12 = sshll.u32 %s258_s11, 3  ;;  %3048 = vmatpush3.bf16.msra.mxu0 %v3399_v12  ;;  %3056 = vmatpush3.bf16.msra.mxu1 %v3400_v13  ;;  %v2763_v24 = vld [vmem:[%s4180_s4] ss:$0 sm:$0xff]  ;;  %v3404_v32 = vld [vmem:[%s4179_s3 + $0x18] sm:$0xff]   ;;  %v3405_v36 = vld [vmem:[%s4178_s2 + $0x10] sm:$0xff]   ;;  %vm1402_vm5 = vcmask 64512  }
  0x17   : > { %s260_s15 = scalar_lea.vmem %s4176_s0, %s2762_s12  ;;  %3049 = vmatprep.subr.bf16.mxu0 %v3561_v14  ;;  %3057 = vmatprep.subr.bf16.mxu1 %v3561_v14  ;;  %v2764_v26 = vld [vmem:[%s4181_s5] ss:$0 sm:$0xff]  ;;  %v3406_v37 = vld [vmem:[%s4179_s3 + $0x10] sm:$0xff]   ;;  %v3407_v38 = vld [vmem:[%s4178_s2 + $0x28] sm:$0xff]   ;;  %vm1634_vm6 = vcmask 64544   ;;  %vm1806_vm7 = vcmask 97344  }
  0x18   : > { %v266_v0 = vld [vmem:[%s260_s15] sm:$0xff]  ;;  %3051 = vmatprep.mubr.msk.bf16.mxu0 %vm3562_vm1, %v3561_v14  ;;  %3059 = vmatprep.mubr.msk.bf16.mxu1 %vm3562_vm1, %v3561_v14  ;;  %v3408_v39 = vld [vmem:[%s4179_s3 + $0x28] sm:$0xff]   ;;  %v3411_v42 = vld [vmem:[%s4178_s2 + $0x38] sm:$0xff]   ;;  %vm1978_vm8 = vcmask 130144   ;;  %vm2150_vm9 = vcmask 162944   ;;  %vm2322_vm10 = vcmask 195744  }
  0x19   : > { %v270_v1 = vsel %vm269_vm0, %v266_v0, 0.0  ;;  %v3409_v40 = vld [vmem:[%s4178_s2 + $0x20] sm:$0xff]   ;;  %v3412_v43 = vld [vmem:[%s4179_s3 + $0x38] sm:$0xff]   ;;  %v3413_v44 = vld [vmem:[%s4178_s2 + $0x30] sm:$0xff]   ;;  %vm2494_vm11 = vcmask 228544   ;;  %s254_s11 = sand.u32 1, %s3543_s22  }
  0x1a   : > { %271 = vadd.xlane.f32.xlu0 %v270_v1  ;;  %3050 = vmatpush3.bf16.msra.mxu0 %v3401_v15  ;;  %v3410_v41 = vld [vmem:[%s4179_s3 + $0x20] sm:$0xff]   ;;  %v3414_v45 = vld [vmem:[%s4179_s3 + $0x30] sm:$0xff]   ;;  %v3415_v46 = vld [vmem:[%s4178_s2 + $0x48] sm:$0xff]   ;;  %vm2666_vm12 = vcmask 261344   ;;  %s2761_s12 = sshll.u32 %s254_s11, 3 }
  0x1b   : > { %3058 = vmatpush3.bf16.msra.mxu1 %v3402_v16  ;;  %3063 = vmatprep.subr.bf16.mxu0 %v3561_v14  ;;  %v3416_v47 = vld [vmem:[%s4179_s3 + $0x48] sm:$0xff]   ;;  %v3417_v48 = vld [vmem:[%s4178_s2 + $0x40] sm:$0xff]   ;;  %v3419_v50 = vld [vmem:[%s4178_s2 + $0x58] sm:$0xff]   ;;  %s256_s14 = scalar_lea.vmem [#allocation5], %s2761_s12 }
  0x1c   : > { %3071 = vmatprep.subr.bf16.mxu1 %v3561_v14  ;;  %v3418_v49 = vld [vmem:[%s4179_s3 + $0x40] sm:$0xff]   ;;  %v3420_v51 = vld [vmem:[%s4179_s3 + $0x58] sm:$0xff]   ;;  %v3421_v52 = vld [vmem:[%s4178_s2 + $0x50] sm:$0xff]   ;;  %s2686_s15 = sshll.u32 %s256_s14, 4  ;;  %s2687_s15 = int_to_ptr.vmem [resolvable:$true] %s2686_s15 }
  0x1d   : > { %v3422_v53 = vld [vmem:[%s4179_s3 + $0x50] sm:$0xff]   ;;  %v3423_v54 = vld [vmem:[%s4178_s2 + $0x68] sm:$0xff]   ;;  %v3425_v56 = vld [vmem:[%s4178_s2 + $0x60] sm:$0xff]  }
  0x1e   : > { %1266 = vadd.xlane.f32.xlu0 %v270_v1  ;;  %v3424_v55 = vld [vmem:[%s4179_s3 + $0x68] sm:$0xff]   ;;  %v3426_v57 = vld [vmem:[%s4179_s3 + $0x60] sm:$0xff]   ;;  %v3427_v58 = vld [vmem:[%s4178_s2 + $0x78] sm:$0xff]  }
  0x1f   : > { %v3428_v59 = vld [vmem:[%s4179_s3 + $0x78] sm:$0xff]   ;;  %v3429_v60 = vld [vmem:[%s4178_s2 + $0x70] sm:$0xff]   ;;  %v3431_v62 = vld [vmem:[%s4177_s1 + $0x8] sm:$0xff]  }
  0x20   : > { %v3430_v61 = vld [vmem:[%s4179_s3 + $0x70] sm:$0xff]   ;;  %v3432_v63 = vld [vmem:[%s4177_s1] sm:$0xff]  }
  0xa3   : > { %v272_v2 = vpop.xlane.xlu0 %271 }
  0xa4   : > { %v274_v3 = vmul.f32 0.03125, %v272_v2 }
  0xa6   : > { %v275_v4 = vsub.f32 %v266_v0, %v274_v3 }
  0xa7   : > { %v1267_v5 = vpop.xlane.xlu0 %1266 }
  0xa8   : > { %v1269_v6 = vmul.f32 0.03125, %v1267_v5  ;;  %v276_v7 = vmul.f32 %v275_v4, %v275_v4 }
  0xaa   : > { %v1270_v8 = vsub.f32 %v266_v0, %v1269_v6  ;;  %v277_v9 = vsel %vm269_vm0, %v276_v7, 0.0 }
  0xab   : > { %278 = vadd.xlane.f32.xlu1 %v277_v9 }
  0xac   : > { %v1271_v10 = vmul.f32 %v1270_v8, %v1270_v8 }
  0xae   : > { %v1272_v11 = vsel %vm269_vm0, %v1271_v10, 0.0 }
  0xaf   : > { %1273 = vadd.xlane.f32.xlu1 %v1272_v11 }
 0x134   : > { %v279_v17 = vpop.xlane.xlu1 %278 }
 0x135   : > { %v280_v18 = vmul.f32 0.03125, %v279_v17 }
 0x137   : > { %v281_v19 = vadd.f32 1e-05, %v280_v18 }
 0x138   : > { %v1274_v20 = vpop.xlane.xlu1 %1273 }
 0x139   : > { %3447 = vrsqrt.f32 %v281_v19  ;;  %v1275_v21 = vmul.f32 0.03125, %v1274_v20 }
 0x13b   : > { %v1276_v22 = vadd.f32 1e-05, %v1275_v21 }
 0x13d   : > { %3449 = vrsqrt.f32 %v1276_v22 }
 0x146   : > { %v3448_v23 = vpop.eup %3447 }
 0x147   : > { %v283_v25 = vmul.f32 %v3448_v23, %v275_v4 }
 0x149   : > { %v290_v27 = vmul.f32 %v2763_v24, %v283_v25 }
 0x14a   : > { %v3450_v28 = vpop.eup %3449 }
 0x14b   : > { %v297_v29 = vadd.f32 %v2764_v26, %v290_v27  ;;  %v1278_v30 = vmul.f32 %v3450_v28, %v1270_v8 }
 0x14d   : > { %v3703_v33 = vpack.c.bf16 %v297_v29, %v297_v29  ;;  %v1285_v34 = vmul.f32 %v2763_v24, %v1278_v30 }
 0x14f   : > { %v3705_v35 = vadd.f32 %v2764_v26, %v1285_v34  ;;  %3052 = vmatmul.mubr.msk.bf16.vlgmr.msra.gmra.mxu0 %vm269_vm0, %v3703_v33  ;;  %3060 = vmatmul.mubr.msk.bf16.vlgmr.msra.gmra.mxu1 %vm269_vm0, %v3703_v33 }
 0x150   : > { %3064 = vmatpush3.bf16.msra.mxu0 %v3403_v31  ;;  %3072 = vmatpush3.bf16.msra.mxu1 %v3404_v32 }
 0x151   : > { %3065 = vmatprep.subr.bf16.mxu0 %v3561_v14  ;;  %3073 = vmatprep.subr.bf16.mxu1 %v3561_v14  ;;  %v3886_v0 = vpack.c.bf16 %v3705_v35, %v3705_v35 }
 0x152   : > { %3067 = vmatprep.mubr.msk.bf16.mxu0 %vm3562_vm1, %v3561_v14  ;;  %3075 = vmatprep.mubr.msk.bf16.mxu1 %vm3562_vm1, %v3561_v14 }
 0x154   : > { %3066 = vmatpush3.bf16.msra.mxu0 %v3405_v36  ;;  %3074 = vmatpush3.bf16.msra.mxu1 %v3406_v37 }
 0x155   : > { %3079 = vmatprep.subr.bf16.mxu0 %v3561_v14  ;;  %3087 = vmatprep.subr.bf16.mxu1 %v3561_v14 }
 0x157   : > { %3068 = vmatmul.mubr.msk.bf16.vlgmr.msra.gmra.mxu0 %vm269_vm0, %v3703_v33  ;;  %3076 = vmatmul.mubr.msk.bf16.vlgmr.msra.gmra.mxu1 %vm269_vm0, %v3703_v33 }
 0x158   : > { %3080 = vmatpush3.bf16.msra.mxu0 %v3407_v38  ;;  %3088 = vmatpush3.bf16.msra.mxu1 %v3408_v39 }
 0x159   : > { %3081 = vmatprep.subr.bf16.mxu0 %v3561_v14  ;;  %3089 = vmatprep.subr.bf16.mxu1 %v3561_v14 }
 0x15a   : > { %3083 = vmatprep.mubr.msk.bf16.mxu0 %vm3562_vm1, %v3561_v14  ;;  %3091 = vmatprep.mubr.msk.bf16.mxu1 %vm3562_vm1, %v3561_v14 }
 0x15c   : > { %3082 = vmatpush3.bf16.msra.mxu0 %v3409_v40  ;;  %3090 = vmatpush3.bf16.msra.mxu1 %v3410_v41 }
 0x15d   : > { %3095 = vmatprep.subr.bf16.mxu0 %v3561_v14  ;;  %3103 = vmatprep.subr.bf16.mxu1 %v3561_v14 }
 0x15f   : > { %3084 = vmatmul.mubr.msk.bf16.vlgmr.msra.gmra.mxu0 %vm269_vm0, %v3703_v33  ;;  %3092 = vmatmul.mubr.msk.bf16.vlgmr.msra.gmra.mxu1 %vm269_vm0, %v3703_v33 }
 0x160   : > { %3096 = vmatpush3.bf16.msra.mxu0 %v3411_v42  ;;  %3104 = vmatpush3.bf16.msra.mxu1 %v3412_v43 }
 0x161   : > { %3097 = vmatprep.subr.bf16.mxu0 %v3561_v14  ;;  %3105 = vmatprep.subr.bf16.mxu1 %v3561_v14 }
 0x162   : > { %3099 = vmatprep.mubr.msk.bf16.mxu0 %vm3562_vm1, %v3561_v14  ;;  %3107 = vmatprep.mubr.msk.bf16.mxu1 %vm3562_vm1, %v3561_v14 }
 0x164   : > { %3098 = vmatpush3.bf16.msra.mxu0 %v3413_v44  ;;  %3106 = vmatpush3.bf16.msra.mxu1 %v3414_v45 }
 0x165   : > { %3111 = vmatprep.subr.bf16.mxu0 %v3561_v14  ;;  %3119 = vmatprep.subr.bf16.mxu1 %v3561_v14 }
 0x167   : > { %3100 = vmatmul.mubr.msk.bf16.vlgmr.msra.gmra.mxu0 %vm269_vm0, %v3703_v33  ;;  %3108 = vmatmul.mubr.msk.bf16.vlgmr.msra.gmra.mxu1 %vm269_vm0, %v3703_v33 }
 0x168   : > { %3112 = vmatpush3.bf16.msra.mxu0 %v3415_v46  ;;  %3120 = vmatpush3.bf16.msra.mxu1 %v3416_v47 }
 0x169   : > { %3113 = vmatprep.subr.bf16.mxu0 %v3561_v14  ;;  %3121 = vmatprep.subr.bf16.mxu1 %v3561_v14 }
 0x16a   : > { %3115 = vmatprep.mubr.msk.bf16.mxu0 %vm3562_vm1, %v3561_v14  ;;  %3123 = vmatprep.mubr.msk.bf16.mxu1 %vm3562_vm1, %v3561_v14 }
 0x16c   : > { %3114 = vmatpush3.bf16.msra.mxu0 %v3417_v48  ;;  %3122 = vmatpush3.bf16.msra.mxu1 %v3418_v49 }
 0x16d   : > { %3127 = vmatprep.subr.bf16.mxu0 %v3561_v14  ;;  %3135 = vmatprep.subr.bf16.mxu1 %v3561_v14 }
 0x16f   : > { %3116 = vmatmul.mubr.msk.bf16.vlgmr.msra.gmra.mxu0 %vm269_vm0, %v3703_v33  ;;  %3124 = vmatmul.mubr.msk.bf16.vlgmr.msra.gmra.mxu1 %vm269_vm0, %v3703_v33 }
 0x170   : > { %3128 = vmatpush3.bf16.msra.mxu0 %v3419_v50  ;;  %3136 = vmatpush3.bf16.msra.mxu1 %v3420_v51 }
 0x171   : > { %3129 = vmatprep.subr.bf16.mxu0 %v3561_v14  ;;  %3137 = vmatprep.subr.bf16.mxu1 %v3561_v14 }
 0x172   : > { %3131 = vmatprep.mubr.msk.bf16.mxu0 %vm3562_vm1, %v3561_v14  ;;  %3139 = vmatprep.mubr.msk.bf16.mxu1 %vm3562_vm1, %v3561_v14 }
 0x174   : > { %3130 = vmatpush3.bf16.msra.mxu0 %v3421_v52  ;;  %3138 = vmatpush3.bf16.msra.mxu1 %v3422_v53 }
 0x175   : > { %3143 = vmatprep.subr.bf16.mxu0 %v3561_v14  ;;  %3151 = vmatprep.subr.bf16.mxu1 %v3561_v14 }
 0x177   : > { %3132 = vmatmul.mubr.msk.bf16.vlgmr.msra.gmra.mxu0 %vm269_vm0, %v3703_v33  ;;  %3140 = vmatmul.mubr.msk.bf16.vlgmr.msra.gmra.mxu1 %vm269_vm0, %v3703_v33 }
 0x178   : > { %3144 = vmatpush3.bf16.msra.mxu0 %v3423_v54  ;;  %3152 = vmatpush3.bf16.msra.mxu1 %v3424_v55 }
 0x179   : > { %3145 = vmatprep.subr.bf16.mxu0 %v3561_v14  ;;  %3153 = vmatprep.subr.bf16.mxu1 %v3561_v14 }
 0x17a   : > { %3147 = vmatprep.mubr.msk.bf16.mxu0 %vm3562_vm1, %v3561_v14  ;;  %3155 = vmatprep.mubr.msk.bf16.mxu1 %vm3562_vm1, %v3561_v14 }
 0x17c   : > { %3146 = vmatpush3.bf16.msra.mxu0 %v3425_v56  ;;  %3154 = vmatpush3.bf16.msra.mxu1 %v3426_v57 }
 0x17d   : > { %3159 = vmatprep.subr.bf16.mxu0 %v3561_v14  ;;  %3167 = vmatprep.subr.bf16.mxu1 %v3561_v14 }
 0x17f   : > { %3148 = vmatmul.mubr.msk.bf16.vlgmr.msra.gmra.mxu0 %vm269_vm0, %v3703_v33  ;;  %3156 = vmatmul.mubr.msk.bf16.vlgmr.msra.gmra.mxu1 %vm269_vm0, %v3703_v33 }
 0x180   : > { %3160 = vmatpush3.bf16.msra.mxu0 %v3427_v58  ;;  %3168 = vmatpush3.bf16.msra.mxu1 %v3428_v59 }
 0x181   : > { %3161 = vmatprep.subr.bf16.mxu0 %v3561_v14  ;;  %3169 = vmatprep.subr.bf16.mxu1 %v3561_v14 }
 0x182   : > { %3163 = vmatprep.mubr.msk.bf16.mxu0 %vm3562_vm1, %v3561_v14  ;;  %3171 = vmatprep.mubr.msk.bf16.mxu1 %vm3562_vm1, %v3561_v14 }
 0x184   : > { %3162 = vmatpush3.bf16.msra.mxu0 %v3429_v60  ;;  %3170 = vmatpush3.bf16.msra.mxu1 %v3430_v61 }
 0x185   : > { %3175 = vmatprep.subr.bf16.mxu0 %v3561_v14  ;;  %3183 = vmatprep.subr.bf16.mxu1 %v3561_v14 }
 0x187   : > { %3164 = vmatmul.mubr.msk.bf16.vlgmr.msra.gmra.mxu0 %vm269_vm0, %v3703_v33  ;;  %3172 = vmatmul.mubr.msk.bf16.vlgmr.msra.gmra.mxu1 %vm269_vm0, %v3703_v33 }
 0x188   : > { %3176 = vmatpush3.bf16.msra.mxu0 %v3431_v62  ;;  %3179 = vmatprep.mubr.msk.bf16.mxu0 %vm3562_vm1, %v3561_v14 }
 0x189   : > { %3177 = vmatprep.subr.bf16.mxu0 %v3561_v14  ;;  %3185 = vmatprep.mubr.msk.bf16.mxu1 %vm3562_vm1, %v3561_v14 }
 0x18c   : > { %3178 = vmatpush3.bf16.msra.mxu0 %v3432_v63 }
 0x18d   : > { %3189 = vmatprep.subr.bf16.mxu0 %v3561_v14 }
 0x18f   : > { %3180 = vmatmul.mubr.msk.bf16.vlgmr.msra.gmra.mxu0 %vm269_vm0, %v3886_v0 }
 0x190   : > { %3191 = vmatprep.mubr.msk.bf16.mxu0 %vm3562_vm1, %v3561_v14 }
 0x20f   : > { %v352_v1 = vpop.f32.mrf.mxu0  ;;  %v411_v2 = vpop.f32.mrf.mxu1 }
 0x210   : > { %v358_v3 = vpack.c.bf16 %v352_v1, %v352_v1  ;;  %v417_v4 = vpack.c.bf16 %v411_v2, %v411_v2 }
 0x211   : > { %v3053_v5 = vpop.f32.mrf.mxu0  ;;  %v3061_v6 = vpop.f32.mrf.mxu1 }
 0x212   : > { %360 = vst.msk [vmem:[#allocation2] sm:$0xf] %vm359_vm2, %v358_v3  ;;  %418 = vst.msk [vmem:[#allocation3] sm:$0xf] %vm359_vm2, %v417_v4 }
 0x213   : > { %v355_v7 = vpop.f32.mrf.mxu0  ;;  %v414_v8 = vpop.f32.mrf.mxu1 }
 0x215   : > { %v3054_v9 = vpop.f32.mrf.mxu0  ;;  %v3062_v10 = vpop.f32.mrf.mxu1 }
 0x217   : > { %v470_v11 = vpop.f32.mrf.mxu0  ;;  %v530_v12 = vpop.f32.mrf.mxu1 }
 0x218   : > { %v476_v13 = vpack.c.bf16 %v470_v11, %v470_v11  ;;  %v536_v15 = vpack.c.bf16 %v530_v12, %v530_v12 }
 0x219   : > { %v3069_v16 = vpop.f32.mrf.mxu0  ;;  %v3077_v17 = vpop.f32.mrf.mxu1  ;;  %v1354_v18 = vld [vmem:[#allocation2] sm:$0xf] }
 0x21a   : > { %v1413_v19 = vld [vmem:[#allocation3] sm:$0xf]  ;;  %478 = vst.msk [vmem:[#allocation2 + $0x4] sm:$0xf] %vm359_vm2, %v476_v13  ;;  %538 = vst.msk [vmem:[#allocation3 + $0x4] sm:$0xf] %vm359_vm2, %v536_v15 }
 0x21b   : > { %v1360_v20 = vsel %vm1355_vm3, %v1354_v18, 0  ;;  %v1419_v21 = vsel %vm1417_vm4, %v1413_v19, 0  ;;  %v473_v22 = vpop.f32.mrf.mxu0  ;;  %v533_v23 = vpop.f32.mrf.mxu1 }
 0x21c   : > { %3184 = vmatpush3.bf16.xpose.msra.mxu1 %v1360_v20  ;;  %3190 = vmatpush3.bf16.msra.mxu0 %v1419_v21 }
 0x21d   : > { %3195 = vmatprep.subr.bf16.mxu1 %v3561_v14  ;;  %3203 = vmatprep.subr.bf16.mxu0 %v3561_v14  ;;  %v3070_v24 = vpop.f32.mrf.mxu0  ;;  %v3078_v25 = vpop.f32.mrf.mxu1 }
 0x21f   : > { %v590_v26 = vpop.f32.mrf.mxu0  ;;  %v650_v27 = vpop.f32.mrf.mxu1 }
 0x220   : > { %v596_v28 = vpack.c.bf16 %v590_v26, %v590_v26  ;;  %v656_v29 = vpack.c.bf16 %v650_v27, %v650_v27  ;;  %v3433_v26 = vld [vmem:[%s4177_s1 + $0x18] sm:$0xff]  }
 0x221   : > { %v3085_v30 = vpop.f32.mrf.mxu0  ;;  %v3093_v31 = vpop.f32.mrf.mxu1 }
 0x222   : > { %598 = vst.msk [vmem:[#allocation2 + $0x8] sm:$0xf] %vm359_vm2, %v596_v28  ;;  %658 = vst.msk [vmem:[#allocation3 + $0x8] sm:$0xf] %vm359_vm2, %v656_v29  ;;  %v3434_v30 = vld [vmem:[%s4177_s1 + $0x10] sm:$0xff]  }
 0x223   : > { %v593_v32 = vpop.f32.mrf.mxu0  ;;  %v653_v33 = vpop.f32.mrf.mxu1 }
 0x224   : > { %v1581_v32 = vld [vmem:[#allocation3 + $0x4] sm:$0xf] }
 0x225   : > { %v3086_v34 = vpop.f32.mrf.mxu0  ;;  %v3094_v36 = vpop.f32.mrf.mxu1  ;;  %v1586_v33 = vsel %vm1417_vm4, %v1581_v32, 0 }
 0x227   : > { %v710_v37 = vpop.f32.mrf.mxu0  ;;  %v770_v38 = vpop.f32.mrf.mxu1 }
 0x228   : > { %v716_v39 = vpack.c.bf16 %v710_v37, %v710_v37  ;;  %v776_v40 = vpack.c.bf16 %v770_v38, %v770_v38 }
 0x229   : > { %v3101_v41 = vpop.f32.mrf.mxu0  ;;  %v3109_v42 = vpop.f32.mrf.mxu1 }
 0x22a   : > { %718 = vst.msk [vmem:[#allocation2 + $0xc] sm:$0xf] %vm359_vm2, %v716_v39  ;;  %778 = vst.msk [vmem:[#allocation3 + $0xc] sm:$0xf] %vm359_vm2, %v776_v40 }
 0x22b   : > { %v713_v43 = vpop.f32.mrf.mxu0  ;;  %v773_v44 = vpop.f32.mrf.mxu1 }
 0x22d   : > { %v3102_v45 = vpop.f32.mrf.mxu0  ;;  %v3110_v46 = vpop.f32.mrf.mxu1 }
 0x22f   : > { %v830_v47 = vpop.f32.mrf.mxu0  ;;  %v890_v48 = vpop.f32.mrf.mxu1 }
 0x230   : > { %v836_v49 = vpack.c.bf16 %v830_v47, %v830_v47  ;;  %v896_v50 = vpack.c.bf16 %v890_v48, %v890_v48  ;;  %v1523_v48 = vld [vmem:[#allocation2 + $0x4] sm:$0xf] }
 0x231   : > { %v3117_v51 = vpop.f32.mrf.mxu0  ;;  %v3125_v52 = vpop.f32.mrf.mxu1 }
 0x232   : > { %838 = vst.msk [vmem:[#allocation2 + $0x10] sm:$0xf] %vm359_vm2, %v836_v49  ;;  %898 = vst.msk [vmem:[#allocation3 + $0x10] sm:$0xf] %vm359_vm2, %v896_v50  ;;  %v1528_v50 = vsel %vm1355_vm3, %v1523_v48, 0  ;;  %v3435_v51 = vld [vmem:[%s4177_s1 + $0x28] sm:$0xff]  }
 0x233   : > { %v833_v53 = vpop.f32.mrf.mxu0  ;;  %v893_v54 = vpop.f32.mrf.mxu1 }
 0x234   : > { %v3436_v53 = vld [vmem:[%s4177_s1 + $0x20] sm:$0xff]   ;;  %v1753_v54 = vld [vmem:[#allocation3 + $0x8] sm:$0xf] }
 0x235   : > { %v3118_v55 = vpop.f32.mrf.mxu0  ;;  %v3126_v56 = vpop.f32.mrf.mxu1 }
 0x236   : > { %v1758_v55 = vsel %vm1417_vm4, %v1753_v54, 0 }
 0x237   : > { %v950_v57 = vpop.f32.mrf.mxu0  ;;  %v1010_v58 = vpop.f32.mrf.mxu1 }
 0x238   : > { %v956_v59 = vpack.c.bf16 %v950_v57, %v950_v57  ;;  %v1016_v60 = vpack.c.bf16 %v1010_v58, %v1010_v58 }
 0x239   : > { %v3133_v61 = vpop.f32.mrf.mxu0  ;;  %v3141_v62 = vpop.f32.mrf.mxu1 }
 0x23a   : > { %958 = vst.msk [vmem:[#allocation2 + $0x14] sm:$0xf] %vm359_vm2, %v956_v59  ;;  %1018 = vst.msk [vmem:[#allocation3 + $0x14] sm:$0xf] %vm359_vm2, %v1016_v60 }
 0x23b   : > { %v953_v63 = vpop.f32.mrf.mxu0  ;;  %v1013_v1 = vpop.f32.mrf.mxu1 }
 0x23d   : > { %v3134_v2 = vpop.f32.mrf.mxu0  ;;  %v3142_v3 = vpop.f32.mrf.mxu1 }
 0x23f   : > { %v1070_v4 = vpop.f32.mrf.mxu0  ;;  %v1130_v5 = vpop.f32.mrf.mxu1 }
 0x240   : > { %v1076_v6 = vpack.c.bf16 %v1070_v4, %v1070_v4  ;;  %v1136_v7 = vpack.c.bf16 %v1130_v5, %v1130_v5 }
 0x241   : > { %v3149_v8 = vpop.f32.mrf.mxu0  ;;  %v3157_v9 = vpop.f32.mrf.mxu1 }
 0x242   : > { %1078 = vst.msk [vmem:[#allocation2 + $0x18] sm:$0xf] %vm359_vm2, %v1076_v6  ;;  %1138 = vst.msk [vmem:[#allocation3 + $0x18] sm:$0xf] %vm359_vm2, %v1136_v7 }
 0x243   : > { %v1073_v10 = vpop.f32.mrf.mxu0  ;;  %v1133_v11 = vpop.f32.mrf.mxu1 }
 0x244   : > { %v1695_v10 = vld [vmem:[#allocation2 + $0x8] sm:$0xf] }
 0x245   : > { %v3150_v12 = vpop.f32.mrf.mxu0  ;;  %v3158_v13 = vpop.f32.mrf.mxu1 }
 0x246   : > { %v1700_v12 = vsel %vm1355_vm3, %v1695_v10, 0  ;;  %v3437_v13 = vld [vmem:[%s4177_s1 + $0x38] sm:$0xff]  }
 0x247   : > { %v1190_v15 = vpop.f32.mrf.mxu0  ;;  %v1250_v16 = vpop.f32.mrf.mxu1 }
 0x248   : > { %v1196_v17 = vpack.c.bf16 %v1190_v15, %v1190_v15  ;;  %v1256_v18 = vpack.c.bf16 %v1250_v16, %v1250_v16  ;;  %v3438_v16 = vld [vmem:[%s4177_s1 + $0x30] sm:$0xff]  }
 0x249   : > { %v3165_v19 = vpop.f32.mrf.mxu0  ;;  %v3173_v20 = vpop.f32.mrf.mxu1 }
 0x24a   : > { %1198 = vst.msk [vmem:[#allocation2 + $0x1c] sm:$0xf] %vm359_vm2, %v1196_v17  ;;  %1258 = vst.msk [vmem:[#allocation3 + $0x1c] sm:$0xf] %vm359_vm2, %v1256_v18  ;;  %v1925_v17 = vld [vmem:[#allocation3 + $0xc] sm:$0xf] }
 0x24b   : > { %v1193_v21 = vpop.f32.mrf.mxu0  ;;  %v1253_v22 = vpop.f32.mrf.mxu1  ;;  %v1930_v18 = vsel %vm1417_vm4, %v1925_v17, 0 }
 0x24d   : > { %v3166_v23 = vpop.f32.mrf.mxu0  ;;  %v3174_v24 = vpop.f32.mrf.mxu1 }
 0x24f   : > { %v1347_v25 = vpop.f32.mrf.mxu0 }
 0x250   : > { %v1353_v27 = vpack.c.bf16 %v1347_v25, %v1347_v25 }
 0x251   : > { %v3181_v28 = vpop.f32.mrf.mxu0 }
 0x252   : > { %3186 = vmatmul.mubr.msk.bf16.vlgmr.msra.gmra.mxu1 %vm1355_vm3, %v1353_v27 }
 0x253   : > { %3196 = vmatpush3.bf16.msra.mxu1 %v3433_v26  ;;  %v1350_v29 = vpop.f32.mrf.mxu0  ;;  %3199 = vmatprep.mubr.msk.bf16.mxu1 %vm3562_vm1, %v3561_v14 }
 0x254   : > { %3197 = vmatprep.subr.bf16.mxu1 %v3561_v14 }
 0x255   : > { %v3182_v31 = vpop.f32.mrf.mxu0 }
 0x257   : > { %3198 = vmatpush3.bf16.msra.mxu1 %v3434_v30 }
 0x258   : > { %3209 = vmatprep.subr.bf16.mxu1 %v3561_v14 }
 0x25a   : > { %3200 = vmatmul.mubr.msk.bf16.vlgmr.msra.gmra.mxu1 %vm269_vm0, %v3886_v0 }
 0x25b   : > { %3210 = vmatpush3.bf16.msra.mxu1 %v1586_v33  ;;  %3211 = vmatprep.mubr.msk.bf16.mxu1 %vm3562_vm1, %v3561_v14 }
 0x25c   : > { %3223 = vmatprep.subr.bf16.mxu1 %v3561_v14 }
 0x312   : > { %v1396_v34 = vpop.f32.mrf.mxu1 }
 0x313   : > { %v1403_v36 = vsel %vm1402_vm5, %v1396_v34, -inf }
 0x314   : > { %1404 = vmax.xlane.f32.xlu0 %v1403_v36  ;;  %v3187_v37 = vpop.f32.mrf.mxu1 }
 0x315   : > { %v1867_v37 = vld [vmem:[#allocation2 + $0xc] sm:$0xf] }
 0x316   : > { %v1399_v38 = vpop.f32.mrf.mxu1 }
 0x318   : > { %v3188_v39 = vpop.f32.mrf.mxu1 }
 0x319   : > { %v1872_v39 = vsel %vm1355_vm3, %v1867_v37, 0  ;;  %v2441_v37 = vld [vmem:[#allocation3 + $0x18] sm:$0xf] }
 0x31a   : > { %v1515_v40 = vpop.f32.mrf.mxu1 }
 0x31b   : > { %v1521_v52 = vpack.c.bf16 %v1515_v40, %v1515_v40  ;;  %v3439_v40 = vld [vmem:[%s4177_s1 + $0x48] sm:$0xff]  }
 0x31c   : > { %v3201_v41 = vpop.f32.mrf.mxu1 }
 0x31e   : > { %v1518_v42 = vpop.f32.mrf.mxu1 }
 0x31f   : > { %v3440_v42 = vld [vmem:[%s4177_s1 + $0x40] sm:$0xff]  }
 0x320   : > { %v3202_v43 = vpop.f32.mrf.mxu1 }
 0x321   : > { %v2097_v43 = vld [vmem:[#allocation3 + $0x10] sm:$0xf] }
 0x39d   : > { %v1405_v44 = vpop.xlane.xlu0 %1404 }
 0x39e   : > { %v1406_v45 = vsub.f32 %v1396_v34, %v1405_v44  ;;  %v2102_v44 = vsel %vm1417_vm4, %v2097_v43, 0 }
 0x3a0   : > { %v1407_v46 = vmul.f32 1.442695, %v1406_v45 }
 0x3a2   : > { %3451 = vpow2.f32 %v1407_v46 }
 0x3af   : > { %v3931_v47 = vpop.eup %3451 }
 0x3b0   : > { %v1412_v49 = vpack.c.bf16 %v3931_v47, %v3931_v47 }
 0x3b2   : > { %3192 = vmatmul.mubr.msk.bf16.vlgmr.msra.gmra.mxu0 %vm1402_vm5, %v1412_v49 }
 0x3b3   : > { %3204 = vmatpush3.bf16.xpose.msra.mxu0 %v1528_v50  ;;  %3205 = vmatprep.mubr.msk.bf16.mxu0 %vm3562_vm1, %v3561_v14 }
 0x3b4   : > { %3215 = vmatprep.subr.bf16.mxu0 %v3561_v14 }
 0x3ba   : > { %3206 = vmatmul.mubr.msk.bf16.vlgmr.msra.gmra.mxu0 %vm1355_vm3, %v1521_v52 }
 0x3bb   : > { %3216 = vmatpush3.bf16.msra.mxu0 %v3435_v51  ;;  %3219 = vmatprep.mubr.msk.bf16.mxu0 %vm3562_vm1, %v3561_v14 }
 0x3bc   : > { %3217 = vmatprep.subr.bf16.mxu0 %v3561_v14 }
 0x3bf   : > { %3218 = vmatpush3.bf16.msra.mxu0 %v3436_v53 }
 0x3c0   : > { %3229 = vmatprep.subr.bf16.mxu0 %v3561_v14 }
 0x3c2   : > { %3220 = vmatmul.mubr.msk.bf16.vlgmr.msra.gmra.mxu0 %vm269_vm0, %v3886_v0 }
 0x3c3   : > { %3230 = vmatpush3.bf16.msra.mxu0 %v1758_v55  ;;  %3231 = vmatprep.mubr.msk.bf16.mxu0 %vm3562_vm1, %v3561_v14 }
 0x3c4   : > { %3243 = vmatprep.subr.bf16.mxu0 %v3561_v14 }
 0x472   : > { %v3957_v56 = vpop.f32.mrf.mxu0 }
 0x474   : > { %v3193_v57 = vpop.f32.mrf.mxu0 }
 0x476   : > { %v1458_v58 = vpop.f32.mrf.mxu0 }
 0x478   : > { %v3194_v59 = vpop.f32.mrf.mxu0 }
 0x47a   : > { %v1564_v60 = vpop.f32.mrf.mxu0 }
 0x47b   : > { %v1570_v61 = vsel %vm1402_vm5, %v1564_v60, -inf }
 0x47c   : > { %1571 = vmax.xlane.f32.xlu1 %v1570_v61  ;;  %v3207_v62 = vpop.f32.mrf.mxu0 }
 0x47e   : > { %v1567_v63 = vpop.f32.mrf.mxu0 }
 0x480   : > { %v3208_v1 = vpop.f32.mrf.mxu0 }
 0x481   : > { %v2039_v1 = vld [vmem:[#allocation2 + $0x10] sm:$0xf] }
 0x482   : > { %v1687_v2 = vpop.f32.mrf.mxu0 }
 0x483   : > { %v1693_v15 = vpack.c.bf16 %v1687_v2, %v1687_v2 }
 0x484   : > { %v3221_v3 = vpop.f32.mrf.mxu0 }
 0x485   : > { %v2044_v3 = vsel %vm1355_vm3, %v2039_v1, 0 }
 0x486   : > { %v1690_v4 = vpop.f32.mrf.mxu0 }
 0x487   : > { %v3441_v4 = vld [vmem:[%s4177_s1 + $0x58] sm:$0xff]  }
 0x488   : > { %v3222_v5 = vpop.f32.mrf.mxu0 }
 0x505   : > { %v1572_v6 = vpop.xlane.xlu1 %1571 }
 0x506   : > { %v1573_v7 = vsub.f32 %v1564_v60, %v1572_v6  ;;  %v3442_v6 = vld [vmem:[%s4177_s1 + $0x50] sm:$0xff]  }
 0x508   : > { %v1574_v8 = vmul.f32 1.442695, %v1573_v7  ;;  %v2269_v7 = vld [vmem:[#allocation3 + $0x14] sm:$0xf] }
 0x50a   : > { %3453 = vpow2.f32 %v1574_v8  ;;  %v2274_v8 = vsel %vm1417_vm4, %v2269_v7, 0 }
 0x517   : > { %v3960_v9 = vpop.eup %3453 }
 0x518   : > { %v1579_v11 = vpack.c.bf16 %v3960_v9, %v3960_v9 }
 0x51a   : > { %3212 = vmatmul.mubr.msk.bf16.vlgmr.msra.gmra.mxu1 %vm1402_vm5, %v1579_v11 }
 0x51b   : > { %3224 = vmatpush3.bf16.xpose.msra.mxu1 %v1700_v12  ;;  %3225 = vmatprep.mubr.msk.bf16.mxu1 %vm3562_vm1, %v3561_v14 }
 0x51c   : > { %3235 = vmatprep.subr.bf16.mxu1 %v3561_v14 }
 0x522   : > { %3226 = vmatmul.mubr.msk.bf16.vlgmr.msra.gmra.mxu1 %vm1355_vm3, %v1693_v15 }
 0x523   : > { %3236 = vmatpush3.bf16.msra.mxu1 %v3437_v13  ;;  %3239 = vmatprep.mubr.msk.bf16.mxu1 %vm3562_vm1, %v3561_v14 }
 0x524   : > { %3237 = vmatprep.subr.bf16.mxu1 %v3561_v14 }
 0x527   : > { %3238 = vmatpush3.bf16.msra.mxu1 %v3438_v16 }
 0x528   : > { %3249 = vmatprep.subr.bf16.mxu1 %v3561_v14 }
 0x52a   : > { %3240 = vmatmul.mubr.msk.bf16.vlgmr.msra.gmra.mxu1 %vm269_vm0, %v3886_v0 }
 0x52b   : > { %3250 = vmatpush3.bf16.msra.mxu1 %v1930_v18  ;;  %3251 = vmatprep.mubr.msk.bf16.mxu1 %vm3562_vm1, %v3561_v14 }
 0x52c   : > { %3263 = vmatprep.subr.bf16.mxu1 %v3561_v14 }
 0x5da   : > { %v3986_v19 = vpop.f32.mrf.mxu1 }
 0x5dc   : > { %v3213_v20 = vpop.f32.mrf.mxu1 }
 0x5de   : > { %v1625_v21 = vpop.f32.mrf.mxu1 }
 0x5e0   : > { %v3214_v22 = vpop.f32.mrf.mxu1 }
 0x5e2   : > { %v1736_v23 = vpop.f32.mrf.mxu1 }
 0x5e3   : > { %v1742_v24 = vsel %vm1402_vm5, %v1736_v23, -inf }
 0x5e4   : > { %1743 = vmax.xlane.f32.xlu0 %v1742_v24  ;;  %v3227_v25 = vpop.f32.mrf.mxu1 }
 0x5e6   : > { %v1739_v26 = vpop.f32.mrf.mxu1 }
 0x5e8   : > { %v3228_v27 = vpop.f32.mrf.mxu1 }
 0x5ea   : > { %v1859_v28 = vpop.f32.mrf.mxu1 }
 0x5eb   : > { %v1865_v41 = vpack.c.bf16 %v1859_v28, %v1859_v28 }
 0x5ec   : > { %v3241_v29 = vpop.f32.mrf.mxu1 }
 0x5ed   : > { %v2211_v29 = vld [vmem:[#allocation2 + $0x14] sm:$0xf] }
 0x5ee   : > { %v1862_v30 = vpop.f32.mrf.mxu1 }
 0x5f0   : > { %v3242_v31 = vpop.f32.mrf.mxu1 }
 0x5f1   : > { %v2216_v31 = vsel %vm1355_vm3, %v2211_v29, 0 }
 0x66d   : > { %v1744_v32 = vpop.xlane.xlu0 %1743 }
 0x66e   : > { %v1745_v33 = vsub.f32 %v1736_v23, %v1744_v32  ;;  %v3443_v32 = vld [vmem:[%s4177_s1 + $0x68] sm:$0xff]  }
 0x670   : > { %v1746_v34 = vmul.f32 1.442695, %v1745_v33 }
 0x672   : > { %3455 = vpow2.f32 %v1746_v34  ;;  %v3444_v34 = vld [vmem:[%s4177_s1 + $0x60] sm:$0xff]  }
 0x67f   : > { %v3989_v36 = vpop.eup %3455 }
 0x680   : > { %v1751_v38 = vpack.c.bf16 %v3989_v36, %v3989_v36 }
 0x682   : > { %3232 = vmatmul.mubr.msk.bf16.vlgmr.msra.gmra.mxu0 %vm1402_vm5, %v1751_v38  ;;  %v2446_v38 = vsel %vm1417_vm4, %v2441_v37, 0 }
 0x683   : > { %3244 = vmatpush3.bf16.xpose.msra.mxu0 %v1872_v39  ;;  %3245 = vmatprep.mubr.msk.bf16.mxu0 %vm3562_vm1, %v3561_v14 }
 0x684   : > { %3255 = vmatprep.subr.bf16.mxu0 %v3561_v14 }
 0x68a   : > { %3246 = vmatmul.mubr.msk.bf16.vlgmr.msra.gmra.mxu0 %vm1355_vm3, %v1865_v41 }
 0x68b   : > { %3256 = vmatpush3.bf16.msra.mxu0 %v3439_v40  ;;  %3259 = vmatprep.mubr.msk.bf16.mxu0 %vm3562_vm1, %v3561_v14 }
 0x68c   : > { %3257 = vmatprep.subr.bf16.mxu0 %v3561_v14 }
 0x68f   : > { %3258 = vmatpush3.bf16.msra.mxu0 %v3440_v42 }
 0x690   : > { %3269 = vmatprep.subr.bf16.mxu0 %v3561_v14 }
 0x692   : > { %3260 = vmatmul.mubr.msk.bf16.vlgmr.msra.gmra.mxu0 %vm269_vm0, %v3886_v0 }
 0x693   : > { %3270 = vmatpush3.bf16.msra.mxu0 %v2102_v44  ;;  %3271 = vmatprep.mubr.msk.bf16.mxu0 %vm3562_vm1, %v3561_v14 }
 0x694   : > { %3283 = vmatprep.subr.bf16.mxu0 %v3561_v14 }
 0x742   : > { %v4015_v45 = vpop.f32.mrf.mxu0 }
 0x744   : > { %v3233_v46 = vpop.f32.mrf.mxu0 }
 0x746   : > { %v1797_v48 = vpop.f32.mrf.mxu0 }
 0x748   : > { %v3234_v49 = vpop.f32.mrf.mxu0 }
 0x74a   : > { %v1908_v50 = vpop.f32.mrf.mxu0 }
 0x74b   : > { %v1914_v51 = vsel %vm1402_vm5, %v1908_v50, -inf }
 0x74c   : > { %1915 = vmax.xlane.f32.xlu1 %v1914_v51  ;;  %v3247_v52 = vpop.f32.mrf.mxu0 }
 0x74e   : > { %v1911_v53 = vpop.f32.mrf.mxu0 }
 0x750   : > { %v3248_v54 = vpop.f32.mrf.mxu0 }
 0x752   : > { %v2031_v55 = vpop.f32.mrf.mxu0 }
 0x753   : > { %v2037_v5 = vpack.c.bf16 %v2031_v55, %v2031_v55 }
 0x754   : > { %v3261_v57 = vpop.f32.mrf.mxu0 }
 0x756   : > { %v2034_v58 = vpop.f32.mrf.mxu0 }
 0x758   : > { %v3262_v59 = vpop.f32.mrf.mxu0 }
 0x759   : > { %v2383_v59 = vld [vmem:[#allocation2 + $0x18] sm:$0xf] }
 0x7d5   : > { %v1916_v60 = vpop.xlane.xlu1 %1915 }
 0x7d6   : > { %v1917_v61 = vsub.f32 %v1908_v50, %v1916_v60 }
 0x7d8   : > { %v1918_v62 = vmul.f32 1.442695, %v1917_v61  ;;  %v2388_v61 = vsel %vm1355_vm3, %v2383_v59, 0 }
 0x7da   : > { %3457 = vpow2.f32 %v1918_v62  ;;  %v3445_v62 = vld [vmem:[%s4177_s1 + $0x78] sm:$0xff]  }
 0x7e7   : > { %v4018_v63 = vpop.eup %3457 }
 0x7e8   : > { %v1923_v2 = vpack.c.bf16 %v4018_v63, %v4018_v63 }
 0x7ea   : > { %3252 = vmatmul.mubr.msk.bf16.vlgmr.msra.gmra.mxu1 %vm1402_vm5, %v1923_v2  ;;  %v3446_v2 = vld [vmem:[%s4177_s1 + $0x70] sm:$0xff]  }
 0x7eb   : > { %3264 = vmatpush3.bf16.xpose.msra.mxu1 %v2044_v3  ;;  %3265 = vmatprep.mubr.msk.bf16.mxu1 %vm3562_vm1, %v3561_v14  ;;  %v2613_v3 = vld [vmem:[#allocation3 + $0x1c] sm:$0xf] }
 0x7ec   : > { %3275 = vmatprep.subr.bf16.mxu1 %v3561_v14 }
 0x7f2   : > { %3266 = vmatmul.mubr.msk.bf16.vlgmr.msra.gmra.mxu1 %vm1355_vm3, %v2037_v5 }
 0x7f3   : > { %3276 = vmatpush3.bf16.msra.mxu1 %v3441_v4  ;;  %3279 = vmatprep.mubr.msk.bf16.mxu1 %vm3562_vm1, %v3561_v14  ;;  %v2618_v4 = vsel %vm1417_vm4, %v2613_v3, 0 }
 0x7f4   : > { %3277 = vmatprep.subr.bf16.mxu1 %v3561_v14 }
 0x7f7   : > { %3278 = vmatpush3.bf16.msra.mxu1 %v3442_v6 }
 0x7f8   : > { %3289 = vmatprep.subr.bf16.mxu1 %v3561_v14 }
 0x7fa   : > { %3280 = vmatmul.mubr.msk.bf16.vlgmr.msra.gmra.mxu1 %vm269_vm0, %v3886_v0 }
 0x7fb   : > { %3290 = vmatpush3.bf16.msra.mxu1 %v2274_v8  ;;  %3291 = vmatprep.mubr.msk.bf16.mxu1 %vm3562_vm1, %v3561_v14 }
 0x7fc   : > { %3303 = vmatprep.subr.bf16.mxu1 %v3561_v14 }
 0x8aa   : > { %v4044_v10 = vpop.f32.mrf.mxu1 }
 0x8ac   : > { %v3253_v11 = vpop.f32.mrf.mxu1 }
 0x8ae   : > { %v1969_v12 = vpop.f32.mrf.mxu1 }
 0x8b0   : > { %v3254_v13 = vpop.f32.mrf.mxu1 }
 0x8b2   : > { %v2080_v15 = vpop.f32.mrf.mxu1 }
 0x8b3   : > { %v2086_v16 = vsel %vm1402_vm5, %v2080_v15, -inf }
 0x8b4   : > { %2087 = vmax.xlane.f32.xlu0 %v2086_v16  ;;  %v3267_v17 = vpop.f32.mrf.mxu1 }
 0x8b6   : > { %v2083_v18 = vpop.f32.mrf.mxu1 }
 0x8b8   : > { %v3268_v20 = vpop.f32.mrf.mxu1 }
 0x8ba   : > { %v2203_v21 = vpop.f32.mrf.mxu1 }
 0x8bb   : > { %v2209_v33 = vpack.c.bf16 %v2203_v21, %v2203_v21 }
 0x8bc   : > { %v3281_v22 = vpop.f32.mrf.mxu1 }
 0x8be   : > { %v2206_v23 = vpop.f32.mrf.mxu1 }
 0x8c0   : > { %v3282_v24 = vpop.f32.mrf.mxu1 }
 0x93d   : > { %v2088_v25 = vpop.xlane.xlu0 %2087 }
 0x93e   : > { %v2089_v26 = vsub.f32 %v2080_v15, %v2088_v25 }
 0x940   : > { %v2090_v27 = vmul.f32 1.442695, %v2089_v26 }
 0x942   : > { %3459 = vpow2.f32 %v2090_v27  ;;  %v2555_v27 = vld [vmem:[#allocation2 + $0x1c] sm:$0xf] }
 0x94f   : > { %v4047_v28 = vpop.eup %3459 }
 0x950   : > { %v2095_v30 = vpack.c.bf16 %v4047_v28, %v4047_v28 }
 0x952   : > { %3272 = vmatmul.mubr.msk.bf16.vlgmr.msra.gmra.mxu0 %vm1402_vm5, %v2095_v30 }
 0x953   : > { %3284 = vmatpush3.bf16.xpose.msra.mxu0 %v2216_v31  ;;  %3285 = vmatprep.mubr.msk.bf16.mxu0 %vm3562_vm1, %v3561_v14 }
 0x954   : > { %3295 = vmatprep.subr.bf16.mxu0 %v3561_v14 }
 0x95a   : > { %3286 = vmatmul.mubr.msk.bf16.vlgmr.msra.gmra.mxu0 %vm1355_vm3, %v2209_v33 }
 0x95b   : > { %3296 = vmatpush3.bf16.msra.mxu0 %v3443_v32  ;;  %3299 = vmatprep.mubr.msk.bf16.mxu0 %vm3562_vm1, %v3561_v14 }
 0x95c   : > { %3297 = vmatprep.subr.bf16.mxu0 %v3561_v14 }
 0x95f   : > { %3298 = vmatpush3.bf16.msra.mxu0 %v3444_v34 }
 0x960   : > { %3309 = vmatprep.subr.bf16.mxu0 %v3561_v14 }
 0x962   : > { %3300 = vmatmul.mubr.msk.bf16.vlgmr.msra.gmra.mxu0 %vm269_vm0, %v3886_v0 }
 0x963   : > { %3310 = vmatpush3.bf16.msra.mxu0 %v2446_v38  ;;  %3311 = vmatprep.mubr.msk.bf16.mxu0 %vm3562_vm1, %v3561_v14 }
 0x964   : > { %3323 = vmatprep.subr.bf16.mxu0 %v3561_v14 }
 0xa12   : > { %v4073_v39 = vpop.f32.mrf.mxu0 }
 0xa14   : > { %v3273_v40 = vpop.f32.mrf.mxu0 }
 0xa16   : > { %v2141_v41 = vpop.f32.mrf.mxu0 }
 0xa18   : > { %v3274_v42 = vpop.f32.mrf.mxu0 }
 0xa1a   : > { %v2252_v43 = vpop.f32.mrf.mxu0 }
 0xa1b   : > { %v2258_v44 = vsel %vm1402_vm5, %v2252_v43, -inf }
 0xa1c   : > { %2259 = vmax.xlane.f32.xlu1 %v2258_v44  ;;  %v3287_v46 = vpop.f32.mrf.mxu0  ;;  %v1748_v44 = vsel %vm1402_vm5, %v3989_v36, 0.0 }
 0xa1d   : > { %v1920_v46 = vsel %vm1402_vm5, %v4018_v63, 0.0 }
 0xa1e   : > { %v2255_v48 = vpop.f32.mrf.mxu0 }
 0xa1f   : > { %v2092_v48 = vsel %vm1402_vm5, %v4047_v28, 0.0 }
 0xa20   : > { %v3288_v49 = vpop.f32.mrf.mxu0 }
 0xa22   : > { %v2375_v50 = vpop.f32.mrf.mxu0 }
 0xa23   : > { %v2381_v1 = vpack.c.bf16 %v2375_v50, %v2375_v50 }
 0xa24   : > { %v3301_v51 = vpop.f32.mrf.mxu0 }
 0xa26   : > { %v2378_v52 = vpop.f32.mrf.mxu0 }
 0xa28   : > { %v3302_v53 = vpop.f32.mrf.mxu0 }
 0xaa5   : > { %v2260_v54 = vpop.xlane.xlu1 %2259 }
 0xaa6   : > { %v2261_v55 = vsub.f32 %v2252_v43, %v2260_v54  ;;  %v1576_v43 = vsel %vm1402_vm5, %v3960_v9, 0.0 }
 0xaa8   : > { %v2262_v57 = vmul.f32 1.442695, %v2261_v55 }
 0xaaa   : > { %3461 = vpow2.f32 %v2262_v57 }
 0xab7   : > { %v4076_v58 = vpop.eup %3461 }
 0xab8   : > { %v2267_v60 = vpack.c.bf16 %v4076_v58, %v4076_v58  ;;  %v2264_v49 = vsel %vm1402_vm5, %v4076_v58, 0.0 }
 0xaba   : > { %3292 = vmatmul.mubr.msk.bf16.vlgmr.msra.gmra.mxu1 %vm1402_vm5, %v2267_v60 }
 0xabb   : > { %3304 = vmatpush3.bf16.xpose.msra.mxu1 %v2388_v61  ;;  %3305 = vmatprep.mubr.msk.bf16.mxu1 %vm3562_vm1, %v3561_v14 }
 0xabc   : > { %3315 = vmatprep.subr.bf16.mxu1 %v3561_v14 }
 0xac2   : > { %3306 = vmatmul.mubr.msk.bf16.vlgmr.msra.gmra.mxu1 %vm1355_vm3, %v2381_v1 }
 0xac3   : > { %3316 = vmatpush3.bf16.msra.mxu1 %v3445_v62  ;;  %3319 = vmatprep.mubr.msk.bf16.mxu1 %vm3562_vm1, %v3561_v14 }
 0xac4   : > { %3317 = vmatprep.subr.bf16.mxu1 %v3561_v14 }
 0xac7   : > { %3318 = vmatpush3.bf16.msra.mxu1 %v3446_v2 }
 0xac8   : > { %3329 = vmatprep.subr.bf16.mxu1 %v3561_v14 }
 0xaca   : > { %3320 = vmatmul.mubr.msk.bf16.vlgmr.msra.gmra.mxu1 %vm269_vm0, %v3886_v0  ;;  %v1409_v0 = vsel %vm1402_vm5, %v3931_v47, 0.0  ;;  %v2560_v47 = vsel %vm1355_vm3, %v2555_v27, 0 }
 0xacb   : > { %3330 = vmatpush3.bf16.msra.mxu1 %v2618_v4  ;;  %3331 = vmatprep.mubr.msk.bf16.mxu1 %vm3562_vm1, %v3561_v14 }
 0xb7a   : > { %v4101_v5 = vpop.f32.mrf.mxu1 }
 0xb7c   : > { %v3293_v6 = vpop.f32.mrf.mxu1 }
 0xb7e   : > { %v2313_v7 = vpop.f32.mrf.mxu1 }
 0xb80   : > { %v3294_v8 = vpop.f32.mrf.mxu1 }
 0xb82   : > { %v2424_v11 = vpop.f32.mrf.mxu1 }
 0xb83   : > { %v2430_v12 = vsel %vm1402_vm5, %v2424_v11, -inf }
 0xb84   : > { %2431 = vmax.xlane.f32.xlu0 %v2430_v12  ;;  %v3307_v13 = vpop.f32.mrf.mxu1 }
 0xb86   : > { %v2427_v15 = vpop.f32.mrf.mxu1 }
 0xb88   : > { %1410 = vadd.xlane.f32.xlu0 %v1409_v0  ;;  %v3308_v16 = vpop.f32.mrf.mxu1 }
 0xb8a   : > { %v2547_v17 = vpop.f32.mrf.mxu1 }
 0xb8b   : > { %v2553_v32 = vpack.c.bf16 %v2547_v17, %v2547_v17 }
 0xb8c   : > { %v3321_v18 = vpop.f32.mrf.mxu1 }
 0xb8e   : > { %v2550_v20 = vpop.f32.mrf.mxu1 }
 0xb90   : > { %v3322_v21 = vpop.f32.mrf.mxu1 }
 0xc0d   : > { %v2432_v22 = vpop.xlane.xlu0 %2431 }
 0xc0e   : > { %v2433_v23 = vsub.f32 %v2424_v11, %v2432_v22 }
 0xc10   : > { %v2434_v24 = vmul.f32 1.442695, %v2433_v23 }
 0xc11   : > { %v1411_v25 = vpop.xlane.xlu0 %1410 }
 0xc12   : > { %3463 = vpow2.f32 %v2434_v24 }
 0xc13   : > { %3465 = vrcp.f32 %v1411_v25 }
 0xc1f   : > { %v3464_v26 = vpop.eup %3463 }
 0xc20   : > { %v3466_v29 = vpop.eup %3465  ;;  %v2439_v30 = vpack.c.bf16 %v3464_v26, %v3464_v26  ;;  %v2436_v9 = vsel %vm1402_vm5, %v3464_v26, 0.0 }
 0xc21   : > { %v1462_v31 = vmul.f32 %v3466_v29, %v3957_v56 }
 0xc22   : > { %3312 = vmatmul.mubr.msk.bf16.vlgmr.msra.gmra.mxu0 %vm1402_vm5, %v2439_v30 }
 0xc23   : > { %3324 = vmatpush3.bf16.xpose.msra.mxu0 %v2560_v47  ;;  %3325 = vmatprep.mubr.msk.bf16.mxu0 %vm3562_vm1, %v3561_v14  ;;  %1463 = vst.msk [vmem:[#allocation4] sm:$0xff] %vm1355_vm3, %v1462_v31 }
 0xc2a   : > { %3326 = vmatmul.mubr.msk.bf16.vlgmr.msra.gmra.mxu0 %vm1355_vm3, %v2553_v32 }
 0xce2   : > { %v4113_v33 = vpop.f32.mrf.mxu0 }
 0xce4   : > { %v3313_v34 = vpop.f32.mrf.mxu0 }
 0xce6   : > { %v2485_v37 = vpop.f32.mrf.mxu0 }
 0xce8   : > { %v3314_v38 = vpop.f32.mrf.mxu0 }
 0xcea   : > { %v2596_v40 = vpop.f32.mrf.mxu0 }
 0xceb   : > { %v2602_v56 = vsel %vm1402_vm5, %v2596_v40, -inf }
 0xcec   : > { %2603 = vmax.xlane.f32.xlu1 %v2602_v56  ;;  %v3327_v41 = vpop.f32.mrf.mxu0 }
 0xcee   : > { %v2599_v42 = vpop.f32.mrf.mxu0 }
 0xcf0   : > { %1577 = vadd.xlane.f32.xlu1 %v1576_v43  ;;  %v3328_v14 = vpop.f32.mrf.mxu0 }
 0xcf4   : > { %1749 = vadd.xlane.f32.xlu1 %v1748_v44 }
 0xcf8   : > { %1921 = vadd.xlane.f32.xlu1 %v1920_v46 }
 0xcfc   : > { %2093 = vadd.xlane.f32.xlu1 %v2092_v48 }
 0xd00   : > { %2265 = vadd.xlane.f32.xlu1 %v2264_v49 }
 0xd04   : > { %2437 = vadd.xlane.f32.xlu1 %v2436_v9 }
 0xd75   : > { %v2604_v50 = vpop.xlane.xlu1 %2603 }
 0xd76   : > { %v2605_v51 = vsub.f32 %v2596_v40, %v2604_v50 }
 0xd78   : > { %v2606_v52 = vmul.f32 1.442695, %v2605_v51 }
 0xd79   : > { %v1578_v36 = vpop.xlane.xlu1 %1577 }
 0xd7a   : > { %3467 = vpow2.f32 %v2606_v52 }
 0xd7b   : > { %3469 = vrcp.f32 %v1578_v36 }
 0xd7d   : > { %v1750_v53 = vpop.xlane.xlu1 %1749 }
 0xd7e   : > { %3471 = vrcp.f32 %v1750_v53 }
 0xd81   : > { %v1922_v63 = vpop.xlane.xlu1 %1921 }
 0xd85   : > { %v2094_v54 = vpop.xlane.xlu1 %2093 }
 0xd86   : > { %3473 = vrcp.f32 %v2094_v54 }
 0xd87   : > { %v3468_v28 = vpop.eup %3467  ;;  %3475 = vrcp.f32 %v1922_v63 }
 0xd88   : > { %v3470_v55 = vpop.eup %3469  ;;  %v2608_v57 = vsel %vm1402_vm5, %v3468_v28, 0.0  ;;  %v2611_v58 = vpack.c.bf16 %v3468_v28, %v3468_v28 }
 0xd89   : > { %2609 = vadd.xlane.f32.xlu1 %v2608_v57  ;;  %v2266_v59 = vpop.xlane.xlu1 %2265  ;;  %v1629_v60 = vmul.f32 %v3470_v55, %v3986_v19 }
 0xd8a   : > { %3477 = vrcp.f32 %v2266_v59  ;;  %3332 = vmatmul.mubr.msk.bf16.vlgmr.msra.gmra.mxu1 %vm1402_vm5, %v2611_v58 }
 0xd8b   : > { %v3472_v61 = vpop.eup %3471  ;;  %1631 = vrot.lane.b32.xlu0 %v1629_v60, %s3563_s18  ;;  %s2684_s18 = scalar_lea.hbm %s4182_s6, %s2940_s13 }
 0xd8c   : > { %v1801_v62 = vmul.f32 %v3472_v61, %v4015_v45 }
 0xd8d   : > { %v2438_v1 = vpop.xlane.xlu1 %2437 }
 0xd8e   : > { %3479 = vrcp.f32 %v2438_v1 }
 0xd8f   : > { %1803 = vrot.lane.b32.xlu0 %v1801_v62, %s3564_s19  ;;  %s2672_s19 = scalar_lea.sflag [#allocation6], %s254_s11 }
 0xd93   : > { %v3474_v2 = vpop.eup %3473 }
 0xd94   : > { %v2145_v3 = vmul.f32 %v3474_v2, %v4073_v39  ;;  %v3476_v4 = vpop.eup %3475 }
 0xd95   : > { %v1973_v19 = vmul.f32 %v3476_v4, %v4044_v10 }
 0xd96   : > { %2147 = vrot.lane.b32.xlu0 %v2145_v3, %s3565_s20  ;;  %s3483_s20 = scalar_lea.vmem %s2687_s15, 128 }
 0xd97   : > { %v3478_v6 = vpop.eup %3477  ;;  %p3484_p12 = scmp.ne.s32.totalorder %s2687_s15, %s3483_s20 }
 0xd98   : > { %v2317_v7 = vmul.f32 %v3478_v6, %v4101_v5 }
 0xd99   : > { %p3485_p13 = pnand %p3484_p12, %p3646_p4 }
 0xd9a   : > { %1975 = vrot.lane.b32.xlu1 %v1973_v19, %s3566_s27  ;;  %2319 = vrot.lane.b32.xlu0 %v2317_v7, %s3567_s28  ;;  %s3570_s27 = smov [#allocation5]  }
 0xd9b   : > { %v3480_v45 = vpop.eup %3479  ;;  %p3486_p0 = pneg %p3485_p13  ;;  %s3487_s24 = sshll.u32 %s3570_s27, 4  ;;  %s3488_s24 = int_to_ptr.vmem [resolvable:$false] %s3487_s24 }
 0xd9c   : > { %v2489_v8 = vmul.f32 %v3480_v45, %v4113_v33  ;;  %s3489_s28 = scalar_lea.vmem %s3488_s24, 256  ;;  %p3490_p1 = scmp.lt.s32.totalorder %s2687_s15, %s3488_s24 }
 0xd9d   : > { %p3491_p2 = scmp.lt.s32.totalorder %s3489_s28, %s3483_s20 }
 0xd9e   : > { %2491 = vrot.lane.b32.xlu0 %v2489_v8, %s3568_s30 }
 0xd9f   : > { %p3492_p3 = por %p3491_p2, %p3490_p1 }
 0xda1   : > { %p3493_p5 = pnand %p3492_p3, %p3486_p0 }
 0xdfd   : > { %v1632_v11 = vpop.permute.xlu0 %1631 }
 0xdfe   : > { %1635 = vst.msk [vmem:[#allocation4] sm:$0xff] %vm1634_vm6, %v1632_v11 }
 0xe01   : > { %v1804_v39 = vpop.permute.xlu0 %1803 }
 0xe02   : > { %1807 = vst.msk [vmem:[#allocation4] sm:$0xff] %vm1806_vm7, %v1804_v39 }
 0xe08   : > { %v2148_v12 = vpop.permute.xlu0 %2147 }
 0xe0c   : > { %v2320_v10 = vpop.permute.xlu0 %2319 }
 0xe10   : > { %v2492_v15 = vpop.permute.xlu0 %2491 }
 0xe12   : > { %v2610_v13 = vpop.xlane.xlu1 %2609 }
 0xe13   : > { %3481 = vrcp.f32 %v2610_v13 }
 0xe16   : > { %v1976_v5 = vpop.permute.xlu1 %1975 }
 0xe17   : > { %1979 = vst.msk [vmem:[#allocation4] sm:$0xff] %vm1978_vm8, %v1976_v5 }
 0xe18   : > { %2151 = vst.msk [vmem:[#allocation4] sm:$0xff] %vm2150_vm9, %v2148_v12 }
 0xe19   : > { %2323 = vst.msk [vmem:[#allocation4] sm:$0xff] %vm2322_vm10, %v2320_v10 }
 0xe1a   : > { %2495 = vst.msk [vmem:[#allocation4] sm:$0xff] %vm2494_vm11, %v2492_v15 }
 0xe20   : > { %v3482_v0 = vpop.eup %3481 }
 0xe4a   : > { %v2654_v16 = vpop.f32.mrf.mxu1 }
 0xe4b   : > { %v2661_v17 = vmul.f32 %v3482_v0, %v2654_v16 }
 0xe4c   : > { %v3333_v18 = vpop.f32.mrf.mxu1 }
 0xe4d   : > { %2663 = vrot.lane.b32.xlu0 %v2661_v17, %s3569_s8 }
 0xe4e   : > { %v2657_v20 = vpop.f32.mrf.mxu1 }
 0xe50   : > { %v3334_v21 = vpop.f32.mrf.mxu1 }
 0xebf   : > { %v2664_v22 = vpop.permute.xlu0 %2663 }
 0xec0   : > { %2667 = vst.msk [vmem:[#allocation4] sm:$0xff] %vm2666_vm12, %v2664_v22 }
 0xec7   : > { %v2668_v23 = vld [vmem:[#allocation4] sm:$0xff] }
 0xec8   : > { %v2669_v24 = vadd.f32 %v2668_v23, %v3705_v35 }
 0xeca   : > { %2670 = vst.msk [vmem:[%s256_s14] sm:$0xff] %vm269_vm0, %v2669_v24 }
 0xecb   : > { %3496 = shalt.err (!%p3493_p5)
}
 0xecc   : > { %s3497_s30 = scalar_lea.hbm %s2684_s18, 128  ;;  %s3501_s12 = scalar_lea.hbm %s4182_s6, 256 }
 0xecd   : > { %p3498_p6 = scmp.ne.s32.totalorder %s2684_s18, %s3497_s30  ;;  %p3502_p10 = scmp.lt.s32.totalorder %s2684_s18, %s4182_s6 }
 0xece   : > { %p3503_p11 = scmp.lt.s32.totalorder %s3501_s12, %s3497_s30 }
 0xecf   : > { %p3499_p7 = pnand %p3498_p6, %p3646_p4 }
 0xed0   : > { %p3504_p12 = por %p3503_p11, %p3502_p10 }
 0xed1   : > { %p3500_p9 = pneg %p3499_p7 }
 0xed3   : > { %p3505_p13 = pnand %p3504_p12, %p3500_p9 }
 0xed5   : > { %3508 = shalt.err (!%p3505_p13)
}
 0xed6   : > { %3335 = dma.vmem_to_hbm [thread:$0]  (%p3646_p4), %s2687_s15, 128, %s2684_s18, %s2672_s19  }
 0xed7 PF: > { %p3341_p0 = scmp.ge.s32.totalorder %s3559_s26, 2  ;;  %s2698_s16 = sand.u32 1, %s3539_s21  }
 0xed8   : > { %s2699_s17 = scalar_lea.sflag [#allocation6], %s2698_s16 }
 0xed9   : > { %p3338_p1 = pnand %p3341_p0, %p3653_p8 }
 0xedb   : > { %p3339_p2 = pneg %p3338_p1 }
 0xedd   : > { %3534 = dma.done.wait (%p3339_p2), %s2699_s17, 128  }
 0xede   : > { %3536 = vsyncadd (%p3339_p2), %s2699_s17, 4294967168  ;;  %s19_s26 = sadd.s32 1, %s3559_s26   ;;  %s4185_s21 = smov %s3543_s22 }
 0xedf   : > { %p16_p3 = scmp.ge.s32.totalorder %s19_s26, 4   ;;  %s4186_s22 = smov %s3547_s23 }
 0xee0   : > { %s4187_s23 = smov %s3659_s10  ;;  %s4188_s24 = smov %s3555_s25 }
 0xee1   : > { %s4189_s25 = smov %s4191_s29  ;;  %18 = sbr.rel (!%p16_p3) target bundleno = 4 (0x4), region = 133 }
 0xee6   :  { %2704 = vsyncpa [#allocation6], 1 }
 0xee7   :  { %2706 = vsyncpa [#allocation6 + $0x1], 1 }

</bundles_post_ra>
